<compile_context>
chip_gen: v6e
topology: v6e:2x2x1
jax: 0.10.0
libtpu: 0.0.40
codegen_flags: <defaults>
</compile_context>

<pallas_src>
import math
import functools

import jax
import jax.numpy as jnp
from jax.experimental import pallas as pl
from jax.experimental.pallas import tpu as pltpu

SQRT_2_OVER_PI = math.sqrt(2.0 / math.pi)


def _gelu_tanh(x):
    # 0.5*x*(1+tanh(sqrt(2/pi)*(x+0.044715*x^3))); cube as x*x*x -> 2 VPU muls,
    # tanh goes to the EUP slot.
    return 0.5 * x * (1.0 + jnp.tanh(SQRT_2_OVER_PI * (x + 0.044715 * (x * x * x))))


def _round_up(a, b):
    return (a + b - 1) // b * b


def _cdiv(a, b):
    return (a + b - 1) // b


def _pick_tm(M, tm_max):
    """Row tile: multiple of 16, <= tm_max, prefer >= 2 row tiles for megacore."""
    m16 = _round_up(M, 16)
    tm_eff = _round_up(min(tm_max, m16), 16)
    if m16 > 16 and _cdiv(m16, tm_eff) < 2:
        tm_eff = _round_up(_cdiv(m16, 2), 16)
    return max(tm_eff, 16)


def _pick_tk(n_state, tk):
    """Hidden tile: divisor of n_state, multiple of 128 (or the full dim)."""
    if 0 < tk <= n_state and n_state % tk == 0 and (tk % 128 == 0 or tk == n_state):
        return tk
    best = None
    c = 128
    while c <= min(tk, n_state):
        if n_state % c == 0:
            best = c
        c += 128
    return best if best is not None else n_state


# ----------------------------------------------------------------------------
# Kernels
# ----------------------------------------------------------------------------

def mlp_kernel_resident(x_ref, w1_ref, b1_ref, w2_ref, b2_ref, o_ref):
    # x_ref : (tm, n_embd)       input dtype (cast to compute dtype here)
    # w1_ref: (n_embd, n_state)  compute dtype, whole array resident in VMEM
    # b1_ref: (1, n_state)       f32
    # w2_ref: (n_state, n_embd)  compute dtype, whole array resident in VMEM
    # b2_ref: (1, n_embd)        f32
    x = x_ref[...].astype(w1_ref.dtype)
    h = jnp.dot(x, w1_ref[...], preferred_element_type=jnp.float32)
    h = _gelu_tanh(h + b1_ref[...])
    out = jnp.dot(h.astype(w2_ref.dtype), w2_ref[...],
                  preferred_element_type=jnp.float32) + b2_ref[...]
    o_ref[...] = out.astype(o_ref.dtype)


def mlp_kernel_streamed(x_ref, w1_ref, b1_ref, w2_ref, b2_ref, o_ref, acc_ref):
    # x_ref : (tm, n_embd)   input dtype
    # w1_ref: (n_embd, tk)   compute dtype
    # b1_ref: (1, tk)        f32
    # w2_ref: (tk, n_embd)   compute dtype
    # b2_ref: (1, n_embd)    f32
    # acc_ref: (tm, n_embd)  f32 accumulator, resident across the k axis
    k = pl.program_id(1)

    @pl.when(k == 0)
    def _init():
        # Seed the accumulator with b2 so finalize is a pure cast/store.
        acc_ref[...] = jnp.broadcast_to(b2_ref[...], acc_ref.shape)

    x = x_ref[...].astype(w1_ref.dtype)
    h = jnp.dot(x, w1_ref[...], preferred_element_type=jnp.float32)
    h = _gelu_tanh(h + b1_ref[...])
    acc_ref[...] += jnp.dot(h.astype(w2_ref.dtype), w2_ref[...],
                            preferred_element_type=jnp.float32)

    @pl.when(k == pl.num_programs(1) - 1)
    def _finalize():
        o_ref[...] = acc_ref[...].astype(o_ref.dtype)


# ----------------------------------------------------------------------------
# Wrapper
# ----------------------------------------------------------------------------

@functools.partial(
    jax.jit,
    static_argnames=("tm", "tk", "compute_dtype", "resident", "vmem_cap_bytes"))
def mlp_forward(x, w1_t, b1, w2_t, b2, *, tm=None, tk=512,
                compute_dtype=jnp.bfloat16, resident=None,
                vmem_cap_bytes=64 * 1024 * 1024):
    """x: [T, B, n_embd]; w1_t: [n_embd, n_state]; w2_t: [n_state, n_embd].

    Store w1_t/w2_t in `compute_dtype` persistently (cast once at param load);
    the astype below is then a no-op.  `vmem_cap_bytes` defaults to the v7x
    physical 64 MiB; pass 128 MiB on v5e/v6e for larger resident configs.
    """
    T, B, n_embd = x.shape
    n_state = w1_t.shape[1]
    M = T * B
    out_dtype = x.dtype

    x2d = x.reshape(M, n_embd)                       # cast happens in-kernel
    w1c = w1_t.astype(compute_dtype)                 # no-op if already compute dtype
    w2c = w2_t.astype(compute_dtype)
    b1_2d = b1.reshape(1, n_state).astype(jnp.float32)
    b2_2d = b2.reshape(1, n_embd).astype(jnp.float32)

    cbytes = jnp.dtype(compute_dtype).itemsize
    xbytes = jnp.dtype(x.dtype).itemsize
    obytes = jnp.dtype(out_dtype).itemsize
    weight_bytes = 2 * n_embd * n_state * cbytes
    safe_limit = max(vmem_cap_bytes - 8 * 1024 * 1024, 16 * 1024 * 1024)

    def resident_need(tm_eff):
        act = 2 * tm_eff * n_embd * (xbytes + obytes)          # double-buffered x/out
        interm = (tm_eff * n_state * (4 + cbytes)              # h f32 + h compute
                  + tm_eff * n_embd * (4 + cbytes))            # out f32 + x compute
        return weight_bytes + 4 * (n_state + n_embd) + act + interm + (2 << 20)

    if resident is None:
        resident = resident_need(_pick_tm(M, 256)) <= safe_limit

    if resident:
        # -------- resident-weight path: 1-D grid over row tiles --------------
        tm_eff = _pick_tm(M, 256 if tm is None else tm)
        M_pad = _round_up(M, tm_eff)
        if M_pad != M:
            x2d = jnp.pad(x2d, ((0, M_pad - M), (0, 0)))
        grid = (M_pad // tm_eff,)
        vmem_limit = int(min(max(resident_need(tm_eff), 24 << 20), safe_limit))

        out2d = pl.pallas_call(
            mlp_kernel_resident,
            out_shape=jax.ShapeDtypeStruct((M_pad, n_embd), out_dtype),
            grid_spec=pltpu.PrefetchScalarGridSpec(
                num_scalar_prefetch=0,
                grid=grid,
                in_specs=[
                    pl.BlockSpec((tm_eff, n_embd), lambda i: (i, 0)),      # x rows
                    pl.BlockSpec(memory_space=pltpu.MemorySpace.VMEM),     # W1 (whole)
                    pl.BlockSpec(memory_space=pltpu.MemorySpace.VMEM),     # b1
                    pl.BlockSpec(memory_space=pltpu.MemorySpace.VMEM),     # W2 (whole)
                    pl.BlockSpec(memory_space=pltpu.MemorySpace.VMEM),     # b2
                ],
                out_specs=pl.BlockSpec((tm_eff, n_embd), lambda i: (i, 0)),
            ),
            compiler_params=pltpu.CompilerParams(
                dimension_semantics=("parallel",),
                vmem_limit_bytes=vmem_limit,
            ),
        )(x2d, w1c, b1_2d, w2c, b2_2d)
    else:
        # -------- streamed-weight path: row tiles x hidden tiles --------------
        tm_eff = _pick_tm(M, 512 if tm is None else tm)
        M_pad = _round_up(M, tm_eff)
        if M_pad != M:
            x2d = jnp.pad(x2d, ((0, M_pad - M), (0, 0)))
        tk_eff = _pick_tk(n_state, tk)
        grid = (M_pad // tm_eff, n_state // tk_eff)

        need = (2 * tm_eff * n_embd * (xbytes + obytes)        # x/out double-buffered
                + 4 * n_embd * tk_eff * cbytes                 # W1/W2 panels x2 bufs
                + tm_eff * n_embd * 4                          # f32 accumulator
                + tm_eff * tk_eff * (4 + cbytes)               # h intermediates
                + tm_eff * n_embd * cbytes
                + 4 * (tk_eff + n_embd)
                + (2 << 20))
        vmem_limit = int(min(max(need, 24 << 20), safe_limit))

        out2d = pl.pallas_call(
            mlp_kernel_streamed,
            out_shape=jax.ShapeDtypeStruct((M_pad, n_embd), out_dtype),
            grid_spec=pltpu.PrefetchScalarGridSpec(
                num_scalar_prefetch=0,
                grid=grid,
                in_specs=[
                    pl.BlockSpec((tm_eff, n_embd), lambda i, k: (i, 0)),   # x rows
                    pl.BlockSpec((n_embd, tk_eff), lambda i, k: (0, k)),   # W1 panel
                    pl.BlockSpec((1, tk_eff), lambda i, k: (0, k)),        # b1 slice
                    pl.BlockSpec((tk_eff, n_embd), lambda i, k: (k, 0)),   # W2 panel
                    pl.BlockSpec((1, n_embd), lambda i, k: (0, 0)),        # b2
                ],
                out_specs=pl.BlockSpec((tm_eff, n_embd), lambda i, k: (i, 0)),
                scratch_shapes=[pltpu.VMEM((tm_eff, n_embd), jnp.float32)],
            ),
            compiler_params=pltpu.CompilerParams(
                dimension_semantics=("parallel", "arbitrary"),
                vmem_limit_bytes=vmem_limit,
            ),
        )(x2d, w1c, b1_2d, w2c, b2_2d)

    return out2d[:M].reshape(T, B, n_embd)


# ----------------------------------------------------------------------------
# Params / reference
# ----------------------------------------------------------------------------

def init_params(key, n_embd, n_state, dtype=jnp.float32):
    # matches MLP.reset_parameters(): weights ~ N(0, 0.02), biases zero.
    k1, k2 = jax.random.split(key)
    # PyTorch Linear weight is (out, in); we store the transpose (in, out).
    w1_t = (0.02 * jax.random.normal(k1, (n_state, n_embd))).T.astype(dtype)
    b1 = jnp.zeros((n_state,), jnp.float32)
    w2_t = (0.02 * jax.random.normal(k2, (n_embd, n_state))).T.astype(dtype)
    b2 = jnp.zeros((n_embd,), jnp.float32)
    return w1_t, b1, w2_t, b2


def _reference(x, w1_t, b1, w2_t, b2, compute_dtype):
    """Pure-JAX reference emulating the kernel's dtype handling."""
    f32 = jnp.float32
    hp = jax.lax.Precision.HIGHEST
    xc = x.astype(compute_dtype).astype(f32)
    w1c = w1_t.astype(compute_dtype).astype(f32)
    w2c = w2_t.astype(compute_dtype).astype(f32)
    h = _gelu_tanh(jnp.dot(xc, w1c, precision=hp) + b1.astype(f32))
    hc = h.astype(compute_dtype).astype(f32)
    out = jnp.dot(hc, w2c, precision=hp) + b2.astype(f32)
    return out.astype(x.dtype)


if __name__ == "__main__":
    # Lane-dense n_embd (multiple of 128); n_state=1024 exercises 2 hidden tiles
    # on the streamed path.
    T, B, n_embd, n_state = 8, 4, 256, 1024

    key = jax.random.PRNGKey(0)
    kx, kp = jax.random.split(key)
    x = jax.random.normal(kx, (T, B, n_embd), dtype=jnp.float32)
    w1_t, b1, w2_t, b2 = init_params(kp, n_embd, n_state, dtype=jnp.float32)

    # Persistent bf16 params (cast ONCE here, not per forward call).
    w1_bf, w2_bf = w1_t.astype(jnp.bfloat16), w2_t.astype(jnp.bfloat16)

    # Default path: resident weights (auto), bf16 operands, f32 accumulation.
    out_res = jax.block_until_ready(
        mlp_forward(x, w1_bf, b1, w2_bf, b2, compute_dtype=jnp.bfloat16))
    ref_bf16 = _reference(x, w1_t, b1, w2_t, b2, jnp.bfloat16)
    assert out_res.shape == (T, B, n_embd)
    assert jnp.allclose(out_res, ref_bf16, atol=2e-2, rtol=2e-2)

    # Forced streamed path, f32 compute, 2 hidden tiles — checks k-accumulation
    # and the b2-seeded accumulator.
    out_str = jax.block_until_ready(
        mlp_forward(x, w1_t, b1, w2_t, b2, compute_dtype=jnp.float32,
                    resident=False, tk=512))
    ref_f32 = _reference(x, w1_t, b1, w2_t, b2, jnp.float32)
    assert jnp.allclose(out_str, ref_f32, atol=5e-3, rtol=5e-3)

    print("KERNEL_OK")
</pallas_src>

<mosaic_0001>
module attributes {stable_mosaic.version = 11 : i64} {
  func.func @mlp_kernel_resident(%arg0: i32, %arg1: memref<16x256xf32, #tpu.memory_space<vmem>>, %arg2: memref<256x1024xbf16, #tpu.memory_space<vmem>>, %arg3: memref<1x1024xf32, #tpu.memory_space<vmem>>, %arg4: memref<1024x256xbf16, #tpu.memory_space<vmem>>, %arg5: memref<1x256xf32, #tpu.memory_space<vmem>>, %arg6: memref<16x256xf32, #tpu.memory_space<vmem>>) attributes {dimension_semantics = [#tpu.dimension_semantics<parallel>], iteration_bounds = array<i64: 2>, scalar_prefetch = 0 : i64, scratch_operands = 0 : i64, tpu.core_type = #tpu.core_type<tc>, window_params = [{transform_indices = @transform_0, window_bounds = array<i64: 16, 256>}, {pipeline_mode = #tpu.pipeline_mode<synchronous>, transform_indices = @transform_1, window_bounds = array<i64: 256, 1024>}, {pipeline_mode = #tpu.pipeline_mode<synchronous>, transform_indices = @transform_2, window_bounds = array<i64: 1, 1024>}, {pipeline_mode = #tpu.pipeline_mode<synchronous>, transform_indices = @transform_3, window_bounds = array<i64: 1024, 256>}, {pipeline_mode = #tpu.pipeline_mode<synchronous>, transform_indices = @transform_4, window_bounds = array<i64: 1, 256>}, {transform_indices = @transform_5, window_bounds = array<i64: 16, 256>}]} {
    %c0 = arith.constant 0 : index
    %c0_0 = arith.constant 0 : index
    %0 = vector.load %arg1[%c0, %c0_0] : memref<16x256xf32, #tpu.memory_space<vmem>>, vector<16x256xf32>
    %1 = arith.truncf %0 : vector<16x256xf32> to vector<16x256xbf16>
    %c0_1 = arith.constant 0 : index
    %c0_2 = arith.constant 0 : index
    %2 = vector.load %arg2[%c0_1, %c0_2] : memref<256x1024xbf16, #tpu.memory_space<vmem>>, vector<256x1024xbf16>
    %cst = arith.constant dense<0.000000e+00> : vector<16x1024xf32>
    %3 = tpu.matmul %1, %2, %cst {dimension_numbers = #tpu.dot_dimension_numbers<[1], [0], [0], [1], [0, 0, 1, 1], [], []>} : vector<16x256xbf16>, vector<256x1024xbf16>, vector<16x1024xf32> -> vector<16x1024xf32>
    %c0_3 = arith.constant 0 : index
    %c0_4 = arith.constant 0 : index
    %4 = vector.load %arg3[%c0_3, %c0_4] : memref<1x1024xf32, #tpu.memory_space<vmem>>, vector<1x1024xf32>
    %5 = vector.broadcast %4 : vector<1x1024xf32> to vector<16x1024xf32>
    %6 = arith.addf %3, %5 : vector<16x1024xf32>
    %cst_5 = arith.constant 5.000000e-01 : f32
    %7 = vector.broadcast %cst_5 : f32 to vector<16x1024xf32>
    %8 = arith.mulf %7, %6 : vector<16x1024xf32>
    %9 = arith.mulf %6, %6 : vector<16x1024xf32>
    %10 = arith.mulf %9, %6 : vector<16x1024xf32>
    %cst_6 = arith.constant 4.471500e-02 : f32
    %11 = vector.broadcast %cst_6 : f32 to vector<16x1024xf32>
    %12 = arith.mulf %11, %10 : vector<16x1024xf32>
    %13 = arith.addf %6, %12 : vector<16x1024xf32>
    %cst_7 = arith.constant 0.797884583 : f32
    %14 = vector.broadcast %cst_7 : f32 to vector<16x1024xf32>
    %15 = arith.mulf %14, %13 : vector<16x1024xf32>
    %16 = math.tanh %15 : vector<16x1024xf32>
    %cst_8 = arith.constant 1.000000e+00 : f32
    %17 = vector.broadcast %cst_8 : f32 to vector<16x1024xf32>
    %18 = arith.addf %17, %16 : vector<16x1024xf32>
    %19 = arith.mulf %8, %18 : vector<16x1024xf32>
    %20 = arith.truncf %19 : vector<16x1024xf32> to vector<16x1024xbf16>
    %c0_9 = arith.constant 0 : index
    %c0_10 = arith.constant 0 : index
    %21 = vector.load %arg4[%c0_9, %c0_10] : memref<1024x256xbf16, #tpu.memory_space<vmem>>, vector<1024x256xbf16>
    %cst_11 = arith.constant dense<0.000000e+00> : vector<16x256xf32>
    %22 = tpu.matmul %20, %21, %cst_11 {dimension_numbers = #tpu.dot_dimension_numbers<[1], [0], [0], [1], [0, 0, 1, 1], [], []>} : vector<16x1024xbf16>, vector<1024x256xbf16>, vector<16x256xf32> -> vector<16x256xf32>
    %c0_12 = arith.constant 0 : index
    %c0_13 = arith.constant 0 : index
    %23 = vector.load %arg5[%c0_12, %c0_13] : memref<1x256xf32, #tpu.memory_space<vmem>>, vector<1x256xf32>
    %24 = vector.broadcast %23 : vector<1x256xf32> to vector<16x256xf32>
    %25 = arith.addf %22, %24 : vector<16x256xf32>
    %c0_14 = arith.constant 0 : index
    %c0_15 = arith.constant 0 : index
    %26 = vector.load %arg6[%c0_14, %c0_15] : memref<16x256xf32, #tpu.memory_space<vmem>>, vector<16x256xf32>
    tpu.vector_store %arg6[%c0_14, %c0_15], %25 {strides = array<i32>} : memref<16x256xf32, #tpu.memory_space<vmem>>, vector<16x256xf32>,
    return
  }
  func.func @transform_0(%arg0: i32) -> (i32, i32) {
    %c0_i32 = arith.constant 0 : i32
    %c0_i32_0 = arith.constant 0 : i32
    return %arg0, %c0_i32 : i32, i32
  }
  func.func @transform_1(%arg0: i32) -> (i32, i32) {
    %c0_i32 = arith.constant 0 : i32
    %c0_i32_0 = arith.constant 0 : i32
    %c0_i32_1 = arith.constant 0 : i32
    return %c0_i32, %c0_i32_0 : i32, i32
  }
  func.func @transform_2(%arg0: i32) -> (i32, i32) {
    %c0_i32 = arith.constant 0 : i32
    %c0_i32_0 = arith.constant 0 : i32
    %c0_i32_1 = arith.constant 0 : i32
    return %c0_i32, %c0_i32_0 : i32, i32
  }
  func.func @transform_3(%arg0: i32) -> (i32, i32) {
    %c0_i32 = arith.constant 0 : i32
    %c0_i32_0 = arith.constant 0 : i32
    %c0_i32_1 = arith.constant 0 : i32
    return %c0_i32, %c0_i32_0 : i32, i32
  }
  func.func @transform_4(%arg0: i32) -> (i32, i32) {
    %c0_i32 = arith.constant 0 : i32
    %c0_i32_0 = arith.constant 0 : i32
    %c0_i32_1 = arith.constant 0 : i32
    return %c0_i32, %c0_i32_0 : i32, i32
  }
  func.func @transform_5(%arg0: i32) -> (i32, i32) {
    %c0_i32 = arith.constant 0 : i32
    %c0_i32_0 = arith.constant 0 : i32
    return %arg0, %c0_i32 : i32, i32
  }
}

</mosaic_0001>

<bundles_post_ra>
// kernel: mlp_forward.1
= control target key start
LH: loop header
LB: loop body
LE: loop exit
PB: predicated region body
PF: predicated region fallthrough
CT: control target
= control target key end

     0   :  { %10 = vsyncpa [#allocation3], 0  ;;  %s3283_s0 = inlined_call_operand.vmem [shape: f32[32,256], index: 0, kind: input, shape index: {}]   ;;  %s3284_s1 = inlined_call_operand.hbm [shape: bf16[256,1024], index: 1, kind: input, shape index: {}]   ;;  %s3285_s2 = inlined_call_operand.vmem [shape: f32[1,1024], index: 2, kind: input, shape index: {}]   ;;  %s3286_s3 = inlined_call_operand.hbm [shape: bf16[1024,256], index: 3, kind: input, shape index: {}]   ;;  %s3287_s4 = inlined_call_operand.vmem [shape: f32[1,256], index: 4, kind: input, shape index: {}]   ;;  %s3288_s5 = inlined_call_operand.vmem [shape: f32[32,256], index: 5, kind: output, shape index: {}]  }
   0x1   :  { %11 = vsyncpa [#allocation5], 0  ;;  %s3075_s18 = smov 0  }
   0x2 LB: > { %s3039_s19 = smov [#allocation2]   ;;  %s2439_s21 = sadd.s32 4294967295, %s3037_s18   ;;  %s3037_s18 = sphi %s3075_s18, %s17_s18  }
   0x3   : > { %s170_s20 = sshll.u32 %s3039_s19, 4  ;;  %p2441_p0 = scmp.ge.s32.totalorder %s3037_s18, 1  ;;  %s171_s20 = int_to_ptr.vmem [resolvable:$true] %s170_s20 }
   0x4   : > { %p158_p1 = scmp.lt.s32.totalorder %s3037_s18, 3  ;;  %p3089_p3 = scmp.eq.s32.totalorder %s2439_s21, 0 }
   0x5   : > { %s3040_s24 = smov [#allocation4]   ;;  %s2982_s27 = scalar_lea.vmem %s171_s20, 16384 }
   0x6   : > { %p3083_p2 = pnand %p2441_p0, %p158_p1  ;;  %s186_s25 = sshll.u32 %s3040_s24, 4  ;;  %s187_s25 = int_to_ptr.vmem [resolvable:$true] %s186_s25 }
   0x7   : > { %p2983_p7 = scmp.ne.s32.totalorder %s171_s20, %s2982_s27  ;;  %p2990_p10 = scmp.lt.s32.totalorder %s171_s20, %s171_s20 }
   0x8   : > { %p2722_p4 = pneg %p3083_p2  ;;  %p2991_p11 = scmp.lt.s32.totalorder %s2982_s27, %s2982_s27 }
   0xa   : > { %p3097_p5 = pnand %p3089_p3, %p2722_p4  ;;  %p2992_p12 = por %p2991_p11, %p2990_p10 }
   0xc   : > { %p2973_p6 = pneg %p3097_p5 }
   0xe   : > { %p2985_p8 = pnand %p2983_p7, %p2973_p6 }
  0x10   : > { %p2986_p9 = pneg %p2985_p8 }
  0x12   : > { %p2993_p13 = pnand %p2992_p12, %p2986_p9 }
  0x14   : > { %2996 = shalt.err (!%p2993_p13)
}
  0x15   : > { %s3041_s28 = smov 512   ;;  %s3042_s29 = smov 32  }
  0x16   : > { %2725 = dma.hbm_to_vmem [thread:$0]  (!%p3097_p5), %s3284_s1, 16384, %s171_s20, [#allocation3], %s3041_s28, %s3041_s28, %s3042_s29  }
  0x17   : > { %s3008_s7 = scalar_lea.vmem %s187_s25, 16384  ;;  %p3016_p7 = scmp.lt.s32.totalorder %s187_s25, %s187_s25 }
  0x18   : > { %p3009_p0 = scmp.ne.s32.totalorder %s187_s25, %s3008_s7  ;;  %p3017_p8 = scmp.lt.s32.totalorder %s3008_s7, %s3008_s7 }
  0x1a   : > { %p3011_p1 = pnand %p3009_p0, %p2973_p6  ;;  %p3018_p10 = por %p3017_p8, %p3016_p7 }
  0x1c   : > { %p3012_p4 = pneg %p3011_p1 }
  0x1e   : > { %p3019_p9 = pnand %p3018_p10, %p3012_p4 }
  0x20   : > { %3022 = shalt.err (!%p3019_p9)
}
  0x21   : > { %s3043_s8 = smov 128   ;;  %s3044_s9 = smov 8  }
  0x22   : > { %2728 = dma.hbm_to_vmem [thread:$0]  (!%p3097_p5), %s3286_s3, 16384, %s187_s25, [#allocation5], %s3043_s8, %s3043_s8, %s3044_s9  }
  0x23   : > { %215 = sbr.rel (%p3083_p2) target bundleno = 612 (0x264), region = 40 }
  0x28   : > { %3028 = dma.done.wait (%p3089_p3), [#allocation3], 16384  }
  0x29   : > { %3030 = vsyncadd (%p3089_p3), [#allocation3], 4294950912 }
  0x2a   : > { %3032 = dma.done.wait (%p3089_p3), [#allocation5], 16384  }
  0x2b   : > { %3034 = vsyncadd (%p3089_p3), [#allocation5], 4294950912  ;;  %v325_v0 = vld [vmem:[#allocation2 + $0x1c0] sm:$0xff]  ;;  %v326_v2 = vld [vmem:[#allocation2 + $0x1c8] sm:$0xff]  ;;  %s2448_s12 = sshll.u32 %s2439_s21, 1 }
  0x2c   : > { %v329_v1 = vld [vmem:[#allocation2 + $0x1e0] sm:$0xff]  ;;  %v330_v4 = vld [vmem:[#allocation2 + $0x1e8] sm:$0xff]  ;;  %p250_p2 = scmp.lt.s32.totalorder %s2448_s12, 3 }
  0x2d   : > { %v2511_v3 = vcombine.high %v325_v0, %v329_v1  ;;  %v2510_v5 = vcombine.low %v325_v0, %v329_v1  ;;  %v317_v6 = vld [vmem:[#allocation2 + $0x180] sm:$0xff]  ;;  %v2513_v8 = vcombine.high %v326_v2, %v330_v4  ;;  %v2512_v9 = vcombine.low %v326_v2, %v330_v4  ;;  %v318_v11 = vld [vmem:[#allocation2 + $0x188] sm:$0xff] }
  0x2e   : > { %v321_v7 = vld [vmem:[#allocation2 + $0x1a0] sm:$0xff]  ;;  %v322_v12 = vld [vmem:[#allocation2 + $0x1a8] sm:$0xff]  ;;  %s3293_s12 = smov (!%p250_p2, %s2448_s12), 3 }
  0x2f   : > { %v2503_v10 = vcombine.high %v317_v6, %v321_v7  ;;  %v309_v13 = vld [vmem:[#allocation2 + $0x140] sm:$0xff]  ;;  %1079 = vmatprep.subr.bf16.mxu0 %v2511_v3  ;;  %v2505_v14 = vcombine.high %v318_v11, %v322_v12  ;;  %v310_v16 = vld [vmem:[#allocation2 + $0x148] sm:$0xff]  ;;  %1122 = vmatprep.subr.bf16.mxu1 %v2513_v8  ;;  %v2502_v18 = vcombine.low %v317_v6, %v321_v7  ;;  %s2712_s13 = sshll.u32 %s3293_s12, 4 }
  0x30   : > { %v313_v15 = vld [vmem:[#allocation2 + $0x160] sm:$0xff]  ;;  %v314_v17 = vld [vmem:[#allocation2 + $0x168] sm:$0xff]  ;;  %1080 = vmatpush1.bf16.msra.mxu0 %v2510_v5  ;;  %1123 = vmatpush1.bf16.msra.mxu1 %v2512_v9  ;;  %v2504_v19 = vcombine.low %v318_v11, %v322_v12  ;;  %s3139_s16 = scalar_lea.vmem %s3283_s0, %s2712_s13  ;;  %s261_s24 = scalar_lea.vmem %s3288_s5, %s2712_s13 }
  0x31   : > { %1081 = vmatprep.subr.bf16.mxu0 %v2503_v10  ;;  %v2495_v20 = vcombine.high %v309_v13, %v313_v15  ;;  %1124 = vmatprep.subr.bf16.mxu1 %v2505_v14  ;;  %v2497_v21 = vcombine.high %v310_v16, %v314_v17  ;;  %v301_v22 = vld [vmem:[#allocation2 + $0x100] sm:$0xff]  ;;  %v302_v24 = vld [vmem:[#allocation2 + $0x108] sm:$0xff]  ;;  %v2494_v26 = vcombine.low %v309_v13, %v313_v15  ;;  %v266_v54 = vld [vmem:[%s3139_s16 + $0x18] sm:$0xff] }
  0x32   : > { %v305_v23 = vld [vmem:[#allocation2 + $0x120] sm:$0xff]  ;;  %v306_v25 = vld [vmem:[#allocation2 + $0x128] sm:$0xff]  ;;  %v2496_v27 = vcombine.low %v310_v16, %v314_v17 }
  0x33   : > { %v2487_v28 = vcombine.high %v301_v22, %v305_v23  ;;  %v2489_v29 = vcombine.high %v302_v24, %v306_v25  ;;  %v293_v30 = vld [vmem:[#allocation2 + $0xc0] sm:$0xff]  ;;  %v294_v32 = vld [vmem:[#allocation2 + $0xc8] sm:$0xff]  ;;  %v2486_v34 = vcombine.low %v301_v22, %v305_v23  ;;  %v2488_v35 = vcombine.low %v302_v24, %v306_v25 }
  0x34   : > { %1082 = vmatpush1.bf16.msra.mxu0 %v2502_v18  ;;  %1125 = vmatpush1.bf16.msra.mxu1 %v2504_v19  ;;  %v297_v31 = vld [vmem:[#allocation2 + $0xe0] sm:$0xff]  ;;  %v298_v33 = vld [vmem:[#allocation2 + $0xe8] sm:$0xff] }
  0x35   : > { %1083 = vmatprep.subr.bf16.mxu0 %v2495_v20  ;;  %1126 = vmatprep.subr.bf16.mxu1 %v2497_v21  ;;  %v2479_v36 = vcombine.high %v293_v30, %v297_v31  ;;  %v2481_v37 = vcombine.high %v294_v32, %v298_v33  ;;  %v285_v38 = vld [vmem:[#allocation2 + $0x80] sm:$0xff]  ;;  %v286_v40 = vld [vmem:[#allocation2 + $0x88] sm:$0xff]  ;;  %v2478_v42 = vcombine.low %v293_v30, %v297_v31 }
  0x36   : > { %v289_v39 = vld [vmem:[#allocation2 + $0xa0] sm:$0xff]  ;;  %v290_v41 = vld [vmem:[#allocation2 + $0xa8] sm:$0xff]  ;;  %v2480_v43 = vcombine.low %v294_v32, %v298_v33 }
  0x37   : > { %v2471_v44 = vcombine.high %v285_v38, %v289_v39  ;;  %v2473_v45 = vcombine.high %v286_v40, %v290_v41  ;;  %v277_v46 = vld [vmem:[#allocation2 + $0x40] sm:$0xff]  ;;  %v278_v48 = vld [vmem:[#allocation2 + $0x48] sm:$0xff]  ;;  %v2470_v50 = vcombine.low %v285_v38, %v289_v39  ;;  %v2472_v51 = vcombine.low %v286_v40, %v290_v41 }
  0x38   : > { %1084 = vmatpush1.bf16.msra.mxu0 %v2494_v26  ;;  %1127 = vmatpush1.bf16.msra.mxu1 %v2496_v27  ;;  %v281_v47 = vld [vmem:[#allocation2 + $0x60] sm:$0xff]  ;;  %v282_v49 = vld [vmem:[#allocation2 + $0x68] sm:$0xff] }
  0x39   : > { %1085 = vmatprep.subr.bf16.mxu0 %v2487_v28  ;;  %1128 = vmatprep.subr.bf16.mxu1 %v2489_v29  ;;  %v2463_v52 = vcombine.high %v277_v46, %v281_v47  ;;  %v264_v53 = vld [vmem:[%s3139_s16 + $0x8] sm:$0xff]  ;;  %v2465_v55 = vcombine.high %v278_v48, %v282_v49  ;;  %v269_v56 = vld [vmem:[#allocation2] sm:$0xff]  ;;  %v2462_v61 = vcombine.low %v277_v46, %v281_v47 }
  0x3a   : > { %v273_v57 = vld [vmem:[#allocation2 + $0x20] sm:$0xff]  ;;  %v3143_v58 = vpack.c.bf16 %v266_v54, %v264_v53  ;;  %v270_v59 = vld [vmem:[#allocation2 + $0x8] sm:$0xff]  ;;  %v2464_v62 = vcombine.low %v278_v48, %v282_v49 }
  0x3b   : > { %v274_v60 = vld [vmem:[#allocation2 + $0x28] sm:$0xff]  ;;  %v2455_v63 = vcombine.high %v269_v56, %v273_v57  ;;  %v389_v1 = vld [vmem:[#allocation2 + $0x3c0] sm:$0xff]  ;;  %v2454_v5 = vcombine.low %v269_v56, %v273_v57 }
  0x3c   : > { %1086 = vmatpush1.bf16.msra.mxu0 %v2486_v34  ;;  %1129 = vmatpush1.bf16.msra.mxu1 %v2488_v35  ;;  %v2457_v0 = vcombine.high %v270_v59, %v274_v60  ;;  %v393_v2 = vld [vmem:[#allocation2 + $0x3e0] sm:$0xff]  ;;  %v390_v3 = vld [vmem:[#allocation2 + $0x3c8] sm:$0xff]  ;;  %v2456_v6 = vcombine.low %v270_v59, %v274_v60 }
  0x3d   : > { %1087 = vmatprep.subr.bf16.mxu0 %v2479_v36  ;;  %1130 = vmatprep.subr.bf16.mxu1 %v2481_v37  ;;  %v394_v4 = vld [vmem:[#allocation2 + $0x3e8] sm:$0xff]  ;;  %v2575_v7 = vcombine.high %v389_v1, %v393_v2  ;;  %v381_v9 = vld [vmem:[#allocation2 + $0x380] sm:$0xff]  ;;  %v2574_v13 = vcombine.low %v389_v1, %v393_v2 }
  0x3e   : > { %1111 = vmatprep.mubr.bf16.mxu0 %v3143_v58  ;;  %1154 = vmatprep.mubr.bf16.mxu1 %v3143_v58  ;;  %v2577_v8 = vcombine.high %v390_v3, %v394_v4  ;;  %v385_v10 = vld [vmem:[#allocation2 + $0x3a0] sm:$0xff]  ;;  %v382_v11 = vld [vmem:[#allocation2 + $0x388] sm:$0xff]  ;;  %v2576_v14 = vcombine.low %v390_v3, %v394_v4  ;;  %v265_v3 = vld [vmem:[%s3139_s16 + $0x10] sm:$0xff] }
  0x3f   : > { %v386_v12 = vld [vmem:[#allocation2 + $0x3a8] sm:$0xff]  ;;  %v2567_v15 = vcombine.high %v381_v9, %v385_v10  ;;  %v373_v17 = vld [vmem:[#allocation2 + $0x340] sm:$0xff]  ;;  %v2566_v21 = vcombine.low %v381_v9, %v385_v10  ;;  %v327_v4 = vld [vmem:[#allocation2 + $0x1d0] sm:$0xff] }
  0x40   : > { %1088 = vmatpush1.bf16.msra.mxu0 %v2478_v42  ;;  %1131 = vmatpush1.bf16.msra.mxu1 %v2480_v43  ;;  %v2569_v16 = vcombine.high %v382_v11, %v386_v12  ;;  %v377_v18 = vld [vmem:[#allocation2 + $0x360] sm:$0xff]  ;;  %v374_v19 = vld [vmem:[#allocation2 + $0x348] sm:$0xff]  ;;  %v2568_v22 = vcombine.low %v382_v11, %v386_v12  ;;  %v319_v9 = vld [vmem:[#allocation2 + $0x190] sm:$0xff] }
  0x41   : > { %1089 = vmatprep.subr.bf16.mxu0 %v2471_v44  ;;  %1132 = vmatprep.subr.bf16.mxu1 %v2473_v45  ;;  %v378_v20 = vld [vmem:[#allocation2 + $0x368] sm:$0xff]  ;;  %v2559_v23 = vcombine.high %v373_v17, %v377_v18  ;;  %v365_v25 = vld [vmem:[#allocation2 + $0x300] sm:$0xff]  ;;  %v2558_v29 = vcombine.low %v373_v17, %v377_v18  ;;  %v323_v10 = vld [vmem:[#allocation2 + $0x1b0] sm:$0xff] }
  0x42   : > { %v2561_v24 = vcombine.high %v374_v19, %v378_v20  ;;  %v369_v26 = vld [vmem:[#allocation2 + $0x320] sm:$0xff]  ;;  %v366_v27 = vld [vmem:[#allocation2 + $0x308] sm:$0xff]  ;;  %v2560_v30 = vcombine.low %v374_v19, %v378_v20  ;;  %v311_v18 = vld [vmem:[#allocation2 + $0x150] sm:$0xff] }
  0x43   : > { %v370_v28 = vld [vmem:[#allocation2 + $0x328] sm:$0xff]  ;;  %v2551_v31 = vcombine.high %v365_v25, %v369_v26  ;;  %v357_v33 = vld [vmem:[#allocation2 + $0x2c0] sm:$0xff]  ;;  %v2550_v37 = vcombine.low %v365_v25, %v369_v26  ;;  %v315_v19 = vld [vmem:[#allocation2 + $0x170] sm:$0xff]  ;;  %v2506_v25 = vcombine.low %v319_v9, %v323_v10 }
  0x44   : > { %1090 = vmatpush1.bf16.msra.mxu0 %v2470_v50  ;;  %1133 = vmatpush1.bf16.msra.mxu1 %v2472_v51  ;;  %v2553_v32 = vcombine.high %v366_v27, %v370_v28  ;;  %v361_v34 = vld [vmem:[#allocation2 + $0x2e0] sm:$0xff]  ;;  %v358_v35 = vld [vmem:[#allocation2 + $0x2c8] sm:$0xff]  ;;  %v2552_v38 = vcombine.low %v366_v27, %v370_v28  ;;  %v303_v26 = vld [vmem:[#allocation2 + $0x110] sm:$0xff] }
  0x45   : > { %1091 = vmatprep.subr.bf16.mxu0 %v2463_v52  ;;  %1134 = vmatprep.subr.bf16.mxu1 %v2465_v55  ;;  %v362_v36 = vld [vmem:[#allocation2 + $0x2e8] sm:$0xff]  ;;  %v2543_v39 = vcombine.high %v357_v33, %v361_v34  ;;  %v349_v41 = vld [vmem:[#allocation2 + $0x280] sm:$0xff]  ;;  %v2542_v45 = vcombine.low %v357_v33, %v361_v34  ;;  %v307_v27 = vld [vmem:[#allocation2 + $0x130] sm:$0xff]  ;;  %v2498_v33 = vcombine.low %v311_v18, %v315_v19 }
  0x46   : > { %v2545_v40 = vcombine.high %v358_v35, %v362_v36  ;;  %v353_v42 = vld [vmem:[#allocation2 + $0x2a0] sm:$0xff]  ;;  %v350_v43 = vld [vmem:[#allocation2 + $0x288] sm:$0xff]  ;;  %v2544_v46 = vcombine.low %v358_v35, %v362_v36  ;;  %v295_v34 = vld [vmem:[#allocation2 + $0xd0] sm:$0xff] }
  0x47   : > { %v354_v44 = vld [vmem:[#allocation2 + $0x2a8] sm:$0xff]  ;;  %v2535_v47 = vcombine.high %v349_v41, %v353_v42  ;;  %v341_v49 = vld [vmem:[#allocation2 + $0x240] sm:$0xff]  ;;  %v2534_v53 = vcombine.low %v349_v41, %v353_v42  ;;  %v299_v35 = vld [vmem:[#allocation2 + $0xf0] sm:$0xff]  ;;  %v2490_v41 = vcombine.low %v303_v26, %v307_v27 }
  0x48   : > { %1092 = vmatpush1.bf16.msra.mxu0 %v2462_v61  ;;  %1135 = vmatpush1.bf16.msra.mxu1 %v2464_v62  ;;  %v2537_v48 = vcombine.high %v350_v43, %v354_v44  ;;  %v345_v50 = vld [vmem:[#allocation2 + $0x260] sm:$0xff]  ;;  %v342_v51 = vld [vmem:[#allocation2 + $0x248] sm:$0xff]  ;;  %v2536_v54 = vcombine.low %v350_v43, %v354_v44  ;;  %v287_v42 = vld [vmem:[#allocation2 + $0x90] sm:$0xff] }
  0x49   : > { %1093 = vmatprep.subr.bf16.mxu0 %v2455_v63  ;;  %1136 = vmatprep.subr.bf16.mxu1 %v2457_v0  ;;  %v346_v52 = vld [vmem:[#allocation2 + $0x268] sm:$0xff]  ;;  %v2527_v55 = vcombine.high %v341_v49, %v345_v50  ;;  %v333_v57 = vld [vmem:[#allocation2 + $0x200] sm:$0xff]  ;;  %v2526_v62 = vcombine.low %v341_v49, %v345_v50  ;;  %v291_v43 = vld [vmem:[#allocation2 + $0xb0] sm:$0xff] }
  0x4a   : > { %v2529_v56 = vcombine.high %v342_v51, %v346_v52  ;;  %v337_v59 = vld [vmem:[#allocation2 + $0x220] sm:$0xff]  ;;  %v334_v60 = vld [vmem:[#allocation2 + $0x208] sm:$0xff]  ;;  %v2528_v63 = vcombine.low %v342_v51, %v346_v52  ;;  %v279_v49 = vld [vmem:[#allocation2 + $0x50] sm:$0xff]  ;;  %v2475_v52 = vcombine.high %v287_v42, %v291_v43 }
  0x4b   : > { %v338_v61 = vld [vmem:[#allocation2 + $0x228] sm:$0xff]  ;;  %v2519_v0 = vcombine.high %v333_v57, %v337_v59  ;;  %v263_v2 = vld [vmem:[%s3139_s16] sm:$0xff]  ;;  %v283_v50 = vld [vmem:[#allocation2 + $0x70] sm:$0xff] }
  0x4c   : > { %1094 = vmatpush1.bf16.msra.mxu0 %v2454_v5  ;;  %1137 = vmatpush1.bf16.msra.mxu1 %v2456_v6  ;;  %v2521_v1 = vcombine.high %v334_v60, %v338_v61  ;;  %v331_v5 = vld [vmem:[#allocation2 + $0x1f0] sm:$0xff]  ;;  %v328_v6 = vld [vmem:[#allocation2 + $0x1d8] sm:$0xff]  ;;  %v2520_v11 = vcombine.low %v334_v60, %v338_v61  ;;  %v2467_v61 = vcombine.high %v279_v49, %v283_v50 }
  0x4d   : > { %1095 = vmatprep.subr.bf16.mxu0 %v2575_v7  ;;  %1138 = vmatprep.subr.bf16.mxu1 %v2577_v8  ;;  %v332_v7 = vld [vmem:[#allocation2 + $0x1f8] sm:$0xff]  ;;  %v2518_v8 = vcombine.low %v333_v57, %v337_v59  ;;  %v2515_v12 = vcombine.high %v327_v4, %v331_v5  ;;  %v2514_v17 = vcombine.low %v327_v4, %v331_v5  ;;  %v271_v57 = vld [vmem:[#allocation2 + $0x10] sm:$0xff] }
  0x4e   : > { %v2516_v20 = vcombine.low %v328_v6, %v332_v7  ;;  %v275_v59 = vld [vmem:[#allocation2 + $0x30] sm:$0xff] }
  0x4f   : > { %v2459_v5 = vcombine.high %v271_v57, %v275_v59 }
  0x50   : > { %1096 = vmatpush2.bf16.msra.mxu0 %v2574_v13  ;;  %1139 = vmatpush2.bf16.msra.mxu1 %v2576_v14  ;;  %v320_v13 = vld [vmem:[#allocation2 + $0x198] sm:$0xff] }
  0x51   : > { %1097 = vmatprep.subr.bf16.mxu0 %v2567_v15  ;;  %1140 = vmatprep.subr.bf16.mxu1 %v2569_v16  ;;  %v324_v14 = vld [vmem:[#allocation2 + $0x1b8] sm:$0xff]  ;;  %v2517_v15 = vcombine.high %v328_v6, %v332_v7  ;;  %v3149_v16 = vpack.c.bf16 %v265_v3, %v263_v2  ;;  %v391_v2 = vld [vmem:[#allocation2 + $0x3d0] sm:$0xff] }
  0x52   : > { %v2508_v28 = vcombine.low %v320_v13, %v324_v14  ;;  %v395_v3 = vld [vmem:[#allocation2 + $0x3f0] sm:$0xff]  ;;  %v392_v6 = vld [vmem:[#allocation2 + $0x3d8] sm:$0xff] }
  0x53   : > { %v396_v7 = vld [vmem:[#allocation2 + $0x3f8] sm:$0xff] }
  0x54   : > { %1098 = vmatpush2.bf16.msra.mxu0 %v2566_v21  ;;  %1141 = vmatpush2.bf16.msra.mxu1 %v2568_v22  ;;  %v2507_v21 = vcombine.high %v319_v9, %v323_v10  ;;  %v312_v22 = vld [vmem:[#allocation2 + $0x158] sm:$0xff]  ;;  %v2458_v9 = vcombine.low %v271_v57, %v275_v59  ;;  %v383_v10 = vld [vmem:[#allocation2 + $0x390] sm:$0xff] }
  0x55   : > { %1099 = vmatprep.subr.bf16.mxu0 %v2559_v23  ;;  %1142 = vmatprep.subr.bf16.mxu1 %v2561_v24  ;;  %v316_v23 = vld [vmem:[#allocation2 + $0x178] sm:$0xff]  ;;  %v2509_v24 = vcombine.high %v320_v13, %v324_v14  ;;  %v2579_v13 = vcombine.high %v391_v2, %v395_v3  ;;  %v2581_v14 = vcombine.high %v392_v6, %v396_v7 }
  0x56   : > { %v2500_v36 = vcombine.low %v312_v22, %v316_v23 }
  0x58   : > { %1100 = vmatpush2.bf16.msra.mxu0 %v2558_v29  ;;  %1143 = vmatpush2.bf16.msra.mxu1 %v2560_v30  ;;  %v2499_v29 = vcombine.high %v311_v18, %v315_v19  ;;  %v304_v30 = vld [vmem:[#allocation2 + $0x118] sm:$0xff]  ;;  %v2578_v18 = vcombine.low %v391_v2, %v395_v3  ;;  %v2580_v19 = vcombine.low %v392_v6, %v396_v7 }
  0x59   : > { %1101 = vmatprep.subr.bf16.mxu0 %v2551_v31  ;;  %1144 = vmatprep.subr.bf16.mxu1 %v2553_v32  ;;  %v308_v31 = vld [vmem:[#allocation2 + $0x138] sm:$0xff]  ;;  %v2501_v32 = vcombine.high %v312_v22, %v316_v23  ;;  %v375_v22 = vld [vmem:[#allocation2 + $0x350] sm:$0xff] }
  0x5a   : > { %v2492_v44 = vcombine.low %v304_v30, %v308_v31  ;;  %v379_v23 = vld [vmem:[#allocation2 + $0x370] sm:$0xff] }
  0x5c   : > { %1102 = vmatpush2.bf16.msra.mxu0 %v2550_v37  ;;  %1145 = vmatpush2.bf16.msra.mxu1 %v2552_v38  ;;  %v2491_v37 = vcombine.high %v303_v26, %v307_v27  ;;  %v296_v38 = vld [vmem:[#allocation2 + $0xd8] sm:$0xff] }
  0x5d   : > { %1103 = vmatprep.subr.bf16.mxu0 %v2543_v39  ;;  %1146 = vmatprep.subr.bf16.mxu1 %v2545_v40  ;;  %v300_v39 = vld [vmem:[#allocation2 + $0xf8] sm:$0xff]  ;;  %v2493_v40 = vcombine.high %v304_v30, %v308_v31  ;;  %v367_v30 = vld [vmem:[#allocation2 + $0x310] sm:$0xff] }
  0x5e   : > { %v2484_v51 = vcombine.low %v296_v38, %v300_v39  ;;  %v371_v31 = vld [vmem:[#allocation2 + $0x330] sm:$0xff] }
  0x60   : > { %1104 = vmatpush2.bf16.msra.mxu0 %v2542_v45  ;;  %1147 = vmatpush2.bf16.msra.mxu1 %v2544_v46  ;;  %v288_v45 = vld [vmem:[#allocation2 + $0x98] sm:$0xff] }
  0x61   : > { %1105 = vmatprep.subr.bf16.mxu0 %v2535_v47  ;;  %1148 = vmatprep.subr.bf16.mxu1 %v2537_v48  ;;  %v292_v46 = vld [vmem:[#allocation2 + $0xb8] sm:$0xff]  ;;  %v2485_v47 = vcombine.high %v296_v38, %v300_v39  ;;  %v2482_v48 = vcombine.low %v295_v34, %v299_v35  ;;  %v359_v38 = vld [vmem:[#allocation2 + $0x2d0] sm:$0xff] }
  0x62   : > { %v2476_v60 = vcombine.low %v288_v45, %v292_v46  ;;  %v363_v39 = vld [vmem:[#allocation2 + $0x2f0] sm:$0xff] }
  0x64   : > { %1106 = vmatpush2.bf16.msra.mxu0 %v2534_v53  ;;  %1149 = vmatpush2.bf16.msra.mxu1 %v2536_v54  ;;  %v280_v53 = vld [vmem:[#allocation2 + $0x58] sm:$0xff] }
  0x65   : > { %1107 = vmatprep.subr.bf16.mxu0 %v2527_v55  ;;  %1150 = vmatprep.subr.bf16.mxu1 %v2529_v56  ;;  %v284_v54 = vld [vmem:[#allocation2 + $0x78] sm:$0xff]  ;;  %v2477_v55 = vcombine.high %v288_v45, %v292_v46  ;;  %v2474_v56 = vcombine.low %v287_v42, %v291_v43  ;;  %v2554_v42 = vcombine.low %v367_v30, %v371_v31  ;;  %v351_v45 = vld [vmem:[#allocation2 + $0x290] sm:$0xff] }
  0x66   : > { %v2468_v4 = vcombine.low %v280_v53, %v284_v54  ;;  %v355_v46 = vld [vmem:[#allocation2 + $0x2b0] sm:$0xff] }
  0x67   : > { %v2538_v57 = vcombine.low %v351_v45, %v355_v46 }
  0x68   : > { %1108 = vmatpush2.bf16.msra.mxu0 %v2526_v62  ;;  %1151 = vmatpush2.bf16.msra.mxu1 %v2528_v63  ;;  %v272_v62 = vld [vmem:[#allocation2 + $0x18] sm:$0xff] }
  0x69   : > { %1109 = vmatprep.subr.bf16.mxu0 %v2519_v0  ;;  %1152 = vmatprep.subr.bf16.mxu1 %v2521_v1  ;;  %v276_v63 = vld [vmem:[#allocation2 + $0x38] sm:$0xff]  ;;  %v2469_v0 = vcombine.high %v280_v53, %v284_v54  ;;  %v2466_v1 = vcombine.low %v279_v49, %v283_v50  ;;  %v2546_v49 = vcombine.low %v359_v38, %v363_v39  ;;  %v343_v53 = vld [vmem:[#allocation2 + $0x250] sm:$0xff] }
  0x6a   : > { %v347_v54 = vld [vmem:[#allocation2 + $0x270] sm:$0xff] }
  0x6b   : > { %v2530_v2 = vcombine.low %v343_v53, %v347_v54 }
  0x6c   : > { %1110 = vmatpush2.bf16.msra.mxu0 %v2518_v8  ;;  %1153 = vmatpush2.bf16.msra.mxu1 %v2520_v11  ;;  %v2461_v8 = vcombine.high %v272_v62, %v276_v63  ;;  %v387_v11 = vld [vmem:[#allocation2 + $0x3b0] sm:$0xff] }
  0x6d   : > { %1165 = vmatprep.subr.bf16.mxu0 %v2515_v12  ;;  %1208 = vmatprep.subr.bf16.mxu1 %v2517_v15  ;;  %v2460_v12 = vcombine.low %v272_v62, %v276_v63  ;;  %v384_v15 = vld [vmem:[#allocation2 + $0x398] sm:$0xff]  ;;  %v2570_v26 = vcombine.low %v383_v10, %v387_v11  ;;  %v335_v62 = vld [vmem:[#allocation2 + $0x210] sm:$0xff] }
  0x6e   : > { %v339_v63 = vld [vmem:[#allocation2 + $0x230] sm:$0xff] }
  0x6f   : > { %1112 = vmatmul.mubr.bf16.vlgmr.msra.gmra.mxu0 %v3149_v16  ;;  %1155 = vmatmul.mubr.bf16.vlgmr.msra.gmra.mxu1 %v3149_v16  ;;  %v2522_v6 = vcombine.low %v335_v62, %v339_v63 }
  0x70   : > { %1166 = vmatpush1.bf16.msra.mxu0 %v2514_v17  ;;  %1209 = vmatpush1.bf16.msra.mxu1 %v2516_v20  ;;  %v388_v17 = vld [vmem:[#allocation2 + $0x3b8] sm:$0xff]  ;;  %v2571_v20 = vcombine.high %v383_v10, %v387_v11 }
  0x71   : > { %1167 = vmatprep.subr.bf16.mxu0 %v2507_v21  ;;  %1210 = vmatprep.subr.bf16.mxu1 %v2509_v24  ;;  %v2573_v21 = vcombine.high %v384_v15, %v388_v17  ;;  %v376_v24 = vld [vmem:[#allocation2 + $0x358] sm:$0xff]  ;;  %v2572_v27 = vcombine.low %v384_v15, %v388_v17  ;;  %v2756_v15 = vld [vmem:[#allocation4 + $0x160] ss:$8 sps:$4 sm:$0xff]  }
  0x72   : > { %1197 = vmatprep.mubr.bf16.mxu0 %v3143_v58  ;;  %1240 = vmatprep.mubr.bf16.mxu1 %v3143_v58  ;;  %v2483_v58 = vcombine.high %v295_v34, %v299_v35  ;;  %v2562_v34 = vcombine.low %v375_v22, %v379_v23  ;;  %v2747_v10 = vld [vmem:[#allocation4 + $0x70] ss:$8 sps:$4 sm:$0xff]   ;;  %v2761_v17 = vld [vmem:[#allocation4 + $0x54] ss:$8 sps:$4 sm:$0xff]  }
  0x73   : > { %v2750_v11 = vld [vmem:[#allocation4 + $0x170] ss:$8 sps:$4 sm:$0xff]  }
  0x74   : > { %1168 = vmatpush1.bf16.msra.mxu0 %v2506_v25  ;;  %1211 = vmatpush1.bf16.msra.mxu1 %v2508_v28  ;;  %v380_v25 = vld [vmem:[#allocation2 + $0x378] sm:$0xff]  ;;  %v2563_v28 = vcombine.high %v375_v22, %v379_v23  ;;  %v2770_v22 = vld [vmem:[#allocation4 + $0x144] ss:$8 sps:$4 sm:$0xff]   ;;  %v2765_v23 = vld [vmem:[#allocation4 + $0x40] ss:$8 sps:$4 sm:$0xff]  }
  0x75   : > { %1169 = vmatprep.subr.bf16.mxu0 %v2499_v29  ;;  %1212 = vmatprep.subr.bf16.mxu1 %v2501_v32  ;;  %v2565_v29 = vcombine.high %v376_v24, %v380_v25  ;;  %v368_v32 = vld [vmem:[#allocation2 + $0x318] sm:$0xff]  ;;  %v2564_v35 = vcombine.low %v376_v24, %v380_v25 }
  0x76   : > { %v2773_v24 = vld [vmem:[#allocation4 + $0x34] ss:$8 sps:$4 sm:$0xff]  }
  0x77   : > { %v2776_v25 = vld [vmem:[#allocation4 + $0x134] ss:$8 sps:$4 sm:$0xff]  }
  0x78   : > { %1170 = vmatpush1.bf16.msra.mxu0 %v2498_v33  ;;  %1213 = vmatpush1.bf16.msra.mxu1 %v2500_v36  ;;  %v372_v33 = vld [vmem:[#allocation2 + $0x338] sm:$0xff]  ;;  %v2555_v36 = vcombine.high %v367_v30, %v371_v31  ;;  %v2777_v30 = vld [vmem:[#allocation4 + $0x20] ss:$8 sps:$4 sm:$0xff]  }
  0x79   : > { %1171 = vmatprep.subr.bf16.mxu0 %v2491_v37  ;;  %1214 = vmatprep.subr.bf16.mxu1 %v2493_v40  ;;  %v2557_v37 = vcombine.high %v368_v32, %v372_v33  ;;  %v360_v40 = vld [vmem:[#allocation2 + $0x2d8] sm:$0xff]  ;;  %v2556_v43 = vcombine.low %v368_v32, %v372_v33  ;;  %v2780_v31 = vld [vmem:[#allocation4 + $0x120] ss:$8 sps:$4 sm:$0xff]  }
  0x7a   : > { %v2785_v32 = vld [vmem:[#allocation4 + $0x14] ss:$8 sps:$4 sm:$0xff]  }
  0x7b   : > { %v2788_v33 = vld [vmem:[#allocation4 + $0x114] ss:$8 sps:$4 sm:$0xff]  }
  0x7c   : > { %1172 = vmatpush1.bf16.msra.mxu0 %v2490_v41  ;;  %1215 = vmatpush1.bf16.msra.mxu1 %v2492_v44  ;;  %v364_v41 = vld [vmem:[#allocation2 + $0x2f8] sm:$0xff]  ;;  %v2547_v44 = vcombine.high %v359_v38, %v363_v39  ;;  %v2789_v38 = vld [vmem:[#allocation4] ss:$8 sps:$4 sm:$0xff]  }
  0x7d   : > { %1173 = vmatprep.subr.bf16.mxu0 %v2483_v58  ;;  %1216 = vmatprep.subr.bf16.mxu1 %v2485_v47  ;;  %v2549_v58 = vcombine.high %v360_v40, %v364_v41  ;;  %v352_v47 = vld [vmem:[#allocation2 + $0x298] sm:$0xff]  ;;  %v2548_v50 = vcombine.low %v360_v40, %v364_v41  ;;  %v2792_v39 = vld [vmem:[#allocation4 + $0x100] ss:$8 sps:$4 sm:$0xff]  }
  0x7e   : > { %v2797_v40 = vld [vmem:[#allocation4 + $0xf4] ss:$8 sps:$4 sm:$0xff]  }
  0x7f   : > { %v2800_v41 = vld [vmem:[#allocation4 + $0x1f4] ss:$8 sps:$4 sm:$0xff]  }
  0x80   : > { %1174 = vmatpush1.bf16.msra.mxu0 %v2482_v48  ;;  %1217 = vmatpush1.bf16.msra.mxu1 %v2484_v51  ;;  %v356_v48 = vld [vmem:[#allocation2 + $0x2b8] sm:$0xff]  ;;  %v2539_v51 = vcombine.high %v351_v45, %v355_v46  ;;  %v2801_v45 = vld [vmem:[#allocation4 + $0xe0] ss:$8 sps:$4 sm:$0xff]  }
  0x81   : > { %1175 = vmatprep.subr.bf16.mxu0 %v2475_v52  ;;  %1218 = vmatprep.subr.bf16.mxu1 %v2477_v55  ;;  %v2541_v52 = vcombine.high %v352_v47, %v356_v48  ;;  %v344_v55 = vld [vmem:[#allocation2 + $0x258] sm:$0xff]  ;;  %v2540_v59 = vcombine.low %v352_v47, %v356_v48  ;;  %v2804_v46 = vld [vmem:[#allocation4 + $0x1e0] ss:$8 sps:$4 sm:$0xff]  }
  0x82   : > { %v2809_v47 = vld [vmem:[#allocation4 + $0xd4] ss:$8 sps:$4 sm:$0xff]  }
  0x83   : > { %v2812_v48 = vld [vmem:[#allocation4 + $0x1d4] ss:$8 sps:$4 sm:$0xff]  }
  0x84   : > { %1176 = vmatpush1.bf16.msra.mxu0 %v2474_v56  ;;  %1219 = vmatpush1.bf16.msra.mxu1 %v2476_v60  ;;  %v348_v56 = vld [vmem:[#allocation2 + $0x278] sm:$0xff]  ;;  %v2531_v60 = vcombine.high %v343_v53, %v347_v54  ;;  %v2813_v53 = vld [vmem:[#allocation4 + $0xc0] ss:$8 sps:$4 sm:$0xff]  }
  0x85   : > { %1177 = vmatprep.subr.bf16.mxu0 %v2467_v61  ;;  %1220 = vmatprep.subr.bf16.mxu1 %v2469_v0  ;;  %v2533_v61 = vcombine.high %v344_v55, %v348_v56  ;;  %v336_v0 = vld [vmem:[#allocation2 + $0x218] sm:$0xff]  ;;  %v2532_v3 = vcombine.low %v344_v55, %v348_v56  ;;  %v2816_v54 = vld [vmem:[#allocation4 + $0x1c0] ss:$8 sps:$4 sm:$0xff]  }
  0x86   : > { %v2821_v55 = vld [vmem:[#allocation4 + $0xb4] ss:$8 sps:$4 sm:$0xff]  }
  0x87   : > { %v2824_v56 = vld [vmem:[#allocation4 + $0x1b4] ss:$8 sps:$4 sm:$0xff]  }
  0x88   : > { %1178 = vmatpush1.bf16.msra.mxu0 %v2466_v1  ;;  %1221 = vmatpush1.bf16.msra.mxu1 %v2468_v4  ;;  %v340_v1 = vld [vmem:[#allocation2 + $0x238] sm:$0xff]  ;;  %v2523_v4 = vcombine.high %v335_v62, %v339_v63  ;;  %v2825_v62 = vld [vmem:[#allocation4 + $0xa0] ss:$8 sps:$4 sm:$0xff]  }
  0x89   : > { %1179 = vmatprep.subr.bf16.mxu0 %v2459_v5  ;;  %1222 = vmatprep.subr.bf16.mxu1 %v2461_v8  ;;  %v2525_v5 = vcombine.high %v336_v0, %v340_v1  ;;  %v2524_v7 = vcombine.low %v336_v0, %v340_v1  ;;  %v2749_v8 = vld [vmem:[#allocation4 + $0x74] ss:$8 sps:$4 sm:$0xff]   ;;  %v2828_v63 = vld [vmem:[#allocation4 + $0x1a0] ss:$8 sps:$4 sm:$0xff]  }
  0x8a   : > { %v2833_v0 = vld [vmem:[#allocation4 + $0x94] ss:$8 sps:$4 sm:$0xff]  }
  0x8b   : > { %v2836_v1 = vld [vmem:[#allocation4 + $0x194] ss:$8 sps:$4 sm:$0xff]  }
  0x8c   : > { %1180 = vmatpush1.bf16.msra.mxu0 %v2458_v9  ;;  %1223 = vmatpush1.bf16.msra.mxu1 %v2460_v12  ;;  %v2752_v9 = vld [vmem:[#allocation4 + $0x174] ss:$8 sps:$4 sm:$0xff]   ;;  %v2755_v12 = vld [vmem:[#allocation4 + $0x64] ss:$8 sps:$4 sm:$0xff]  }
  0x8d   : > { %1181 = vmatprep.subr.bf16.mxu0 %v2579_v13  ;;  %1224 = vmatprep.subr.bf16.mxu1 %v2581_v14  ;;  %v2758_v13 = vld [vmem:[#allocation4 + $0x164] ss:$8 sps:$4 sm:$0xff]   ;;  %v2753_v14 = vld [vmem:[#allocation4 + $0x60] ss:$8 sps:$4 sm:$0xff]  }
  0x90   : > { %1182 = vmatpush2.bf16.msra.mxu0 %v2578_v18  ;;  %1225 = vmatpush2.bf16.msra.mxu1 %v2580_v19  ;;  %v2764_v18 = vld [vmem:[#allocation4 + $0x154] ss:$8 sps:$4 sm:$0xff]   ;;  %v2759_v19 = vld [vmem:[#allocation4 + $0x50] ss:$8 sps:$4 sm:$0xff]  }
  0x91   : > { %1183 = vmatprep.subr.bf16.mxu0 %v2571_v20  ;;  %1226 = vmatprep.subr.bf16.mxu1 %v2573_v21  ;;  %v2762_v20 = vld [vmem:[#allocation4 + $0x150] ss:$8 sps:$4 sm:$0xff]   ;;  %v2767_v21 = vld [vmem:[#allocation4 + $0x44] ss:$8 sps:$4 sm:$0xff]  }
  0x94   : > { %1184 = vmatpush2.bf16.msra.mxu0 %v2570_v26  ;;  %1227 = vmatpush2.bf16.msra.mxu1 %v2572_v27  ;;  %v2771_v26 = vld [vmem:[#allocation4 + $0x30] ss:$8 sps:$4 sm:$0xff]  }
  0x95   : > { %1185 = vmatprep.subr.bf16.mxu0 %v2563_v28  ;;  %1228 = vmatprep.subr.bf16.mxu1 %v2565_v29  ;;  %v2774_v27 = vld [vmem:[#allocation4 + $0x130] ss:$8 sps:$4 sm:$0xff]   ;;  %v2779_v28 = vld [vmem:[#allocation4 + $0x24] ss:$8 sps:$4 sm:$0xff]  }
  0x96   : > { %v2782_v29 = vld [vmem:[#allocation4 + $0x124] ss:$8 sps:$4 sm:$0xff]  }
  0x98   : > { %1186 = vmatpush2.bf16.msra.mxu0 %v2562_v34  ;;  %1229 = vmatpush2.bf16.msra.mxu1 %v2564_v35  ;;  %v2783_v34 = vld [vmem:[#allocation4 + $0x10] ss:$8 sps:$4 sm:$0xff]  }
  0x99   : > { %1187 = vmatprep.subr.bf16.mxu0 %v2555_v36  ;;  %1230 = vmatprep.subr.bf16.mxu1 %v2557_v37  ;;  %v2786_v35 = vld [vmem:[#allocation4 + $0x110] ss:$8 sps:$4 sm:$0xff]   ;;  %v2791_v36 = vld [vmem:[#allocation4 + $0x4] ss:$8 sps:$4 sm:$0xff]  }
  0x9a   : > { %v2794_v37 = vld [vmem:[#allocation4 + $0x104] ss:$8 sps:$4 sm:$0xff]  }
  0x9c   : > { %1188 = vmatpush2.bf16.msra.mxu0 %v2554_v42  ;;  %1231 = vmatpush2.bf16.msra.mxu1 %v2556_v43  ;;  %v2795_v42 = vld [vmem:[#allocation4 + $0xf0] ss:$8 sps:$4 sm:$0xff]  }
  0x9d   : > { %1189 = vmatprep.subr.bf16.mxu0 %v2547_v44  ;;  %1232 = vmatprep.subr.bf16.mxu1 %v2549_v58  ;;  %v2798_v43 = vld [vmem:[#allocation4 + $0x1f0] ss:$8 sps:$4 sm:$0xff]   ;;  %v2803_v44 = vld [vmem:[#allocation4 + $0xe4] ss:$8 sps:$4 sm:$0xff]  }
  0x9e   : > { %v2806_v58 = vld [vmem:[#allocation4 + $0x1e4] ss:$8 sps:$4 sm:$0xff]  }
  0xa0   : > { %1190 = vmatpush2.bf16.msra.mxu0 %v2546_v49  ;;  %1233 = vmatpush2.bf16.msra.mxu1 %v2548_v50  ;;  %v2807_v49 = vld [vmem:[#allocation4 + $0xd0] ss:$8 sps:$4 sm:$0xff]  }
  0xa1   : > { %1191 = vmatprep.subr.bf16.mxu0 %v2539_v51  ;;  %1234 = vmatprep.subr.bf16.mxu1 %v2541_v52  ;;  %v2810_v50 = vld [vmem:[#allocation4 + $0x1d0] ss:$8 sps:$4 sm:$0xff]   ;;  %v2815_v51 = vld [vmem:[#allocation4 + $0xc4] ss:$8 sps:$4 sm:$0xff]  }
  0xa2   : > { %v2818_v52 = vld [vmem:[#allocation4 + $0x1c4] ss:$8 sps:$4 sm:$0xff]  }
  0xa4   : > { %1192 = vmatpush2.bf16.msra.mxu0 %v2538_v57  ;;  %1235 = vmatpush2.bf16.msra.mxu1 %v2540_v59  ;;  %v2819_v57 = vld [vmem:[#allocation4 + $0xb0] ss:$8 sps:$4 sm:$0xff]  }
  0xa5   : > { %1193 = vmatprep.subr.bf16.mxu0 %v2531_v60  ;;  %1236 = vmatprep.subr.bf16.mxu1 %v2533_v61  ;;  %v2822_v59 = vld [vmem:[#allocation4 + $0x1b0] ss:$8 sps:$4 sm:$0xff]   ;;  %v2827_v60 = vld [vmem:[#allocation4 + $0xa4] ss:$8 sps:$4 sm:$0xff]  }
  0xa6   : > { %v2830_v61 = vld [vmem:[#allocation4 + $0x1a4] ss:$8 sps:$4 sm:$0xff]  }
  0xa8   : > { %1194 = vmatpush2.bf16.msra.mxu0 %v2530_v2  ;;  %1237 = vmatpush2.bf16.msra.mxu1 %v2532_v3  ;;  %v2831_v2 = vld [vmem:[#allocation4 + $0x90] ss:$8 sps:$4 sm:$0xff]  }
  0xa9   : > { %1195 = vmatprep.subr.bf16.mxu0 %v2523_v4  ;;  %1238 = vmatprep.subr.bf16.mxu1 %v2525_v5  ;;  %v2834_v3 = vld [vmem:[#allocation4 + $0x190] ss:$8 sps:$4 sm:$0xff]   ;;  %v2839_v4 = vld [vmem:[#allocation4 + $0x84] ss:$8 sps:$4 sm:$0xff]  }
  0xaa   : > { %v2842_v5 = vld [vmem:[#allocation4 + $0x184] ss:$8 sps:$4 sm:$0xff]  }
  0xac   : > { %1196 = vmatpush2.bf16.msra.mxu0 %v2522_v6  ;;  %1239 = vmatpush2.bf16.msra.mxu1 %v2524_v7  ;;  %v2837_v6 = vld [vmem:[#allocation4 + $0x80] ss:$8 sps:$4 sm:$0xff]  }
  0xad   : > { %2183 = vmatprep.subr.bf16.mxu0 %v2749_v8  ;;  %2226 = vmatprep.subr.bf16.mxu1 %v2752_v9  ;;  %v2840_v7 = vld [vmem:[#allocation4 + $0x180] ss:$8 sps:$4 sm:$0xff]   ;;  %v2845_v8 = vld [vmem:[#allocation4 + $0x274] ss:$8 sps:$4 sm:$0xff]  }
  0xae   : > { %v2848_v9 = vld [vmem:[#allocation4 + $0x374] ss:$8 sps:$4 sm:$0xff]  }
  0xaf   : > { %1198 = vmatmul.mubr.bf16.vlgmr.msra.gmra.mxu0 %v3149_v16  ;;  %1241 = vmatmul.mubr.bf16.vlgmr.msra.gmra.mxu1 %v3149_v16  ;;  %v2768_v16 = vld [vmem:[#allocation4 + $0x140] ss:$8 sps:$4 sm:$0xff]  }
  0xb0   : > { %2184 = vmatpush1.bf16.msra.mxu0 %v2747_v10  ;;  %2227 = vmatpush1.bf16.msra.mxu1 %v2750_v11  ;;  %v399_v10 = vlaneseq }
  0xb1   : > { %2185 = vmatprep.subr.bf16.mxu0 %v2755_v12  ;;  %2228 = vmatprep.subr.bf16.mxu1 %v2758_v13  ;;  %v3163_v13 = vld [vmem:[%s3285_s2] sm:$0xff] }
  0xb2   : > { %v3157_v11 = vshrl.u32 %v399_v10, 7 }
  0xb4   : > { %2186 = vmatpush1.bf16.msra.mxu0 %v2753_v14  ;;  %2229 = vmatpush1.bf16.msra.mxu1 %v2756_v15  ;;  %v401_v12 = vsub.s32 0, %v3157_v11  ;;  %v409_v14 = vsub.s32 2, %v3157_v11  ;;  %v405_v15 = vsub.s32 1, %v3157_v11 }
  0xb5   : > { %2187 = vmatprep.subr.bf16.mxu0 %v2761_v17  ;;  %2230 = vmatprep.subr.bf16.mxu1 %v2764_v18  ;;  %v413_v17 = vsub.s32 3, %v3157_v11 }
  0xb6   : > { %v402_v18 = vrot.slane %v3163_v13, %v401_v12 }
  0xb8   : > { %2188 = vmatpush1.bf16.msra.mxu0 %v2759_v19  ;;  %2231 = vmatpush1.bf16.msra.mxu1 %v2762_v20  ;;  %v410_v19 = vrot.slane %v3163_v13, %v409_v14  ;;  %v406_v20 = vrot.slane %v3163_v13, %v405_v15 }
  0xb9   : > { %2189 = vmatprep.subr.bf16.mxu0 %v2767_v21  ;;  %2232 = vmatprep.subr.bf16.mxu1 %v2770_v22  ;;  %v414_v22 = vrot.slane %v3163_v13, %v413_v17 }
  0xbc   : > { %2190 = vmatpush1.bf16.msra.mxu0 %v2765_v23  ;;  %2233 = vmatpush1.bf16.msra.mxu1 %v2768_v16 }
  0xbd   : > { %2191 = vmatprep.subr.bf16.mxu0 %v2773_v24  ;;  %2234 = vmatprep.subr.bf16.mxu1 %v2776_v25 }
  0xc0   : > { %2192 = vmatpush1.bf16.msra.mxu0 %v2771_v26  ;;  %2235 = vmatpush1.bf16.msra.mxu1 %v2774_v27 }
  0xc1   : > { %2193 = vmatprep.subr.bf16.mxu0 %v2779_v28  ;;  %2236 = vmatprep.subr.bf16.mxu1 %v2782_v29 }
  0xc4   : > { %2194 = vmatpush1.bf16.msra.mxu0 %v2777_v30  ;;  %2237 = vmatpush1.bf16.msra.mxu1 %v2780_v31 }
  0xc5   : > { %2195 = vmatprep.subr.bf16.mxu0 %v2785_v32  ;;  %2238 = vmatprep.subr.bf16.mxu1 %v2788_v33 }
  0xc8   : > { %2196 = vmatpush1.bf16.msra.mxu0 %v2783_v34  ;;  %2239 = vmatpush1.bf16.msra.mxu1 %v2786_v35 }
  0xc9   : > { %2197 = vmatprep.subr.bf16.mxu0 %v2791_v36  ;;  %2240 = vmatprep.subr.bf16.mxu1 %v2794_v37 }
  0xcc   : > { %2198 = vmatpush1.bf16.msra.mxu0 %v2789_v38  ;;  %2241 = vmatpush1.bf16.msra.mxu1 %v2792_v39 }
  0xcd   : > { %2199 = vmatprep.subr.bf16.mxu0 %v2797_v40  ;;  %2242 = vmatprep.subr.bf16.mxu1 %v2800_v41 }
  0xd0   : > { %2200 = vmatpush2.bf16.msra.mxu0 %v2795_v42  ;;  %2243 = vmatpush2.bf16.msra.mxu1 %v2798_v43 }
  0xd1   : > { %2201 = vmatprep.subr.bf16.mxu0 %v2803_v44  ;;  %2244 = vmatprep.subr.bf16.mxu1 %v2806_v58 }
  0xd4   : > { %2202 = vmatpush2.bf16.msra.mxu0 %v2801_v45  ;;  %2245 = vmatpush2.bf16.msra.mxu1 %v2804_v46 }
  0xd5   : > { %2203 = vmatprep.subr.bf16.mxu0 %v2809_v47  ;;  %2246 = vmatprep.subr.bf16.mxu1 %v2812_v48 }
  0xd8   : > { %2204 = vmatpush2.bf16.msra.mxu0 %v2807_v49  ;;  %2247 = vmatpush2.bf16.msra.mxu1 %v2810_v50 }
  0xd9   : > { %2205 = vmatprep.subr.bf16.mxu0 %v2815_v51  ;;  %2248 = vmatprep.subr.bf16.mxu1 %v2818_v52 }
  0xdc   : > { %2206 = vmatpush2.bf16.msra.mxu0 %v2813_v53  ;;  %2249 = vmatpush2.bf16.msra.mxu1 %v2816_v54 }
  0xdd   : > { %2207 = vmatprep.subr.bf16.mxu0 %v2821_v55  ;;  %2250 = vmatprep.subr.bf16.mxu1 %v2824_v56 }
  0xe0   : > { %2208 = vmatpush2.bf16.msra.mxu0 %v2819_v57  ;;  %2251 = vmatpush2.bf16.msra.mxu1 %v2822_v59 }
  0xe1   : > { %2209 = vmatprep.subr.bf16.mxu0 %v2827_v60  ;;  %2252 = vmatprep.subr.bf16.mxu1 %v2830_v61 }
  0xe4   : > { %2210 = vmatpush2.bf16.msra.mxu0 %v2825_v62  ;;  %2253 = vmatpush2.bf16.msra.mxu1 %v2828_v63 }
  0xe5   : > { %2211 = vmatprep.subr.bf16.mxu0 %v2833_v0  ;;  %2254 = vmatprep.subr.bf16.mxu1 %v2836_v1 }
  0xe8   : > { %2212 = vmatpush2.bf16.msra.mxu0 %v2831_v2  ;;  %2255 = vmatpush2.bf16.msra.mxu1 %v2834_v3 }
  0xe9   : > { %2213 = vmatprep.subr.bf16.mxu0 %v2839_v4  ;;  %2256 = vmatprep.subr.bf16.mxu1 %v2842_v5 }
  0xec   : > { %2214 = vmatpush2.bf16.msra.mxu0 %v2837_v6  ;;  %2257 = vmatpush2.bf16.msra.mxu1 %v2840_v7 }
  0xed   : > { %2269 = vmatprep.subr.bf16.mxu0 %v2845_v8  ;;  %2312 = vmatprep.subr.bf16.mxu1 %v2848_v9 }
 0x12f   : > { %v1113_v21 = vpop.f32.mrf.mxu0  ;;  %v1156_v16 = vpop.f32.mrf.mxu1 }
 0x130   : > { %v3176_v23 = vadd.f32 %v1113_v21, %v402_v18  ;;  %v3178_v24 = vadd.f32 %v1156_v16, %v410_v19 }
 0x131   : > { %v1115_v25 = vpop.f32.mrf.mxu0  ;;  %v1158_v28 = vpop.f32.mrf.mxu1 }
 0x132   : > { %v1267_v26 = vmul.f32 %v3176_v23, %v3176_v23  ;;  %v3182_v27 = vadd.f32 %v1115_v25, %v406_v20  ;;  %v1269_v29 = vmul.f32 %v3178_v24, %v3178_v24  ;;  %v3186_v30 = vadd.f32 %v1158_v28, %v414_v22 }
 0x133   : > { %v1117_v31 = vpop.f32.mrf.mxu0  ;;  %v1160_v35 = vpop.f32.mrf.mxu1 }
 0x134   : > { %v1283_v32 = vmul.f32 %v1267_v26, %v3176_v23  ;;  %v1268_v33 = vmul.f32 %v3182_v27, %v3182_v27  ;;  %v1118_v34 = vadd.f32 %v1117_v31, %v402_v18  ;;  %v1285_v36 = vmul.f32 %v1269_v29, %v3178_v24 }
 0x135   : > { %v1270_v37 = vmul.f32 %v3186_v30, %v3186_v30  ;;  %v1161_v38 = vadd.f32 %v1160_v35, %v410_v19  ;;  %v1119_v39 = vpop.f32.mrf.mxu0  ;;  %v1162_v43 = vpop.f32.mrf.mxu1  ;;  %v1251_v26 = vmul.f32 0.5, %v3176_v23 }
 0x136   : > { %v1299_v40 = vmul.f32 0.044715, %v1283_v32  ;;  %v1284_v41 = vmul.f32 %v1268_v33, %v3182_v27  ;;  %v1275_v42 = vmul.f32 %v1118_v34, %v1118_v34  ;;  %v1301_v44 = vmul.f32 0.044715, %v1285_v36 }
 0x137   : > { %v1286_v58 = vmul.f32 %v1270_v37, %v3186_v30  ;;  %v1277_v45 = vmul.f32 %v1161_v38, %v1161_v38  ;;  %v1120_v49 = vadd.f32 %v1119_v39, %v406_v20  ;;  %v1163_v53 = vadd.f32 %v1162_v43, %v414_v22 }
 0x138   : > { %v1315_v46 = vadd.f32 %v1299_v40, %v3176_v23  ;;  %v1300_v47 = vmul.f32 0.044715, %v1284_v41  ;;  %v1291_v48 = vmul.f32 %v1275_v42, %v1118_v34  ;;  %v1317_v50 = vadd.f32 %v1301_v44, %v3178_v24 }
 0x139   : > { %v1302_v51 = vmul.f32 0.044715, %v1286_v58  ;;  %v1293_v52 = vmul.f32 %v1277_v45, %v1161_v38  ;;  %v1276_v57 = vmul.f32 %v1120_v49, %v1120_v49  ;;  %v1278_v61 = vmul.f32 %v1163_v53, %v1163_v53 }
 0x13a   : > { %v1331_v54 = vmul.f32 0.7978846, %v1315_v46  ;;  %v1316_v55 = vadd.f32 %v1300_v47, %v3182_v27  ;;  %v1307_v56 = vmul.f32 0.044715, %v1291_v48  ;;  %v1333_v4 = vmul.f32 0.7978846, %v1317_v50 }
 0x13b   : > { %v1318_v59 = vadd.f32 %v1302_v51, %v3186_v30  ;;  %v1309_v60 = vmul.f32 0.044715, %v1293_v52  ;;  %v1292_v0 = vmul.f32 %v1276_v57, %v1120_v49  ;;  %v1294_v3 = vmul.f32 %v1278_v61, %v1163_v53  ;;  %v2852_v57 = vld [vmem:[#allocation4 + $0x360] ss:$8 sps:$4 sm:$0xff]   ;;  %v2855_v61 = vld [vmem:[#allocation4 + $0x250] ss:$8 sps:$4 sm:$0xff]  }
 0x13c   : > { %v1332_v62 = vmul.f32 0.7978846, %v1316_v55  ;;  %v1323_v63 = vadd.f32 %v1307_v56, %v1118_v34  ;;  %2939 = vtanh.f32 %v1331_v54  ;;  %v1259_v32 = vmul.f32 0.5, %v1118_v34  ;;  %v2843_v54 = vld [vmem:[#allocation4 + $0x270] ss:$8 sps:$4 sm:$0xff]  }
 0x13d   : > { %v1334_v1 = vmul.f32 0.7978846, %v1318_v59  ;;  %v1325_v2 = vadd.f32 %v1309_v60, %v1161_v38  ;;  %v1308_v6 = vmul.f32 0.044715, %v1292_v0  ;;  %v1310_v8 = vmul.f32 0.044715, %v1294_v3 }
 0x13e   : > { %2941 = vtanh.f32 %v1332_v62  ;;  %v1339_v5 = vmul.f32 0.7978846, %v1323_v63  ;;  %v1252_v33 = vmul.f32 0.5, %v3182_v27  ;;  %v1261_v39 = vmul.f32 0.5, %v1161_v38  ;;  %v2846_v55 = vld [vmem:[#allocation4 + $0x370] ss:$8 sps:$4 sm:$0xff]  }
 0x13f   : > { %2943 = vtanh.f32 %v1334_v1  ;;  %v1341_v7 = vmul.f32 0.7978846, %v1325_v2  ;;  %v1324_v9 = vadd.f32 %v1308_v6, %v1120_v49  ;;  %v1326_v10 = vadd.f32 %v1310_v8, %v1163_v53  ;;  %v2851_v56 = vld [vmem:[#allocation4 + $0x264] ss:$8 sps:$4 sm:$0xff]   ;;  %v2857_v59 = vld [vmem:[#allocation4 + $0x254] ss:$8 sps:$4 sm:$0xff]  }
 0x140   : > { %2945 = vtanh.f32 %v1339_v5  ;;  %v1260_v40 = vmul.f32 0.5, %v1120_v49  ;;  %v1254_v43 = vmul.f32 0.5, %v3186_v30  ;;  %v1262_v44 = vmul.f32 0.5, %v1163_v53  ;;  %v2854_v53 = vld [vmem:[#allocation4 + $0x364] ss:$8 sps:$4 sm:$0xff]  }
 0x141   : > { %2947 = vtanh.f32 %v1341_v7  ;;  %v1340_v14 = vmul.f32 0.7978846, %v1324_v9  ;;  %v1342_v17 = vmul.f32 0.7978846, %v1326_v10  ;;  %v1253_v23 = vmul.f32 0.5, %v3178_v24 }
 0x142   : > { %2949 = vtanh.f32 %v1333_v4  ;;  %v2849_v24 = vld [vmem:[#allocation4 + $0x260] ss:$8 sps:$4 sm:$0xff]   ;;  %v2860_v60 = vld [vmem:[#allocation4 + $0x354] ss:$8 sps:$4 sm:$0xff]   ;;  %v2858_v62 = vld [vmem:[#allocation4 + $0x350] ss:$8 sps:$4 sm:$0xff]  }
 0x143   : > { %2951 = vtanh.f32 %v1340_v14  ;;  %v2863_v63 = vld [vmem:[#allocation4 + $0x244] ss:$8 sps:$4 sm:$0xff]   ;;  %v2861_v1 = vld [vmem:[#allocation4 + $0x240] ss:$8 sps:$4 sm:$0xff]   ;;  %v2869_v3 = vld [vmem:[#allocation4 + $0x234] ss:$8 sps:$4 sm:$0xff]  }
 0x144   : > { %2953 = vtanh.f32 %v1342_v17  ;;  %v2866_v0 = vld [vmem:[#allocation4 + $0x344] ss:$8 sps:$4 sm:$0xff]   ;;  %v2864_v2 = vld [vmem:[#allocation4 + $0x340] ss:$8 sps:$4 sm:$0xff]   ;;  %v2872_v4 = vld [vmem:[#allocation4 + $0x334] ss:$8 sps:$4 sm:$0xff]  }
 0x145   : > { %v2867_v5 = vld [vmem:[#allocation4 + $0x230] ss:$8 sps:$4 sm:$0xff]   ;;  %v2875_v7 = vld [vmem:[#allocation4 + $0x224] ss:$8 sps:$4 sm:$0xff]   ;;  %v417_v9 = vsub.s32 4, %v3157_v11  ;;  %v425_v10 = vsub.s32 6, %v3157_v11 }
 0x146   : > { %v2870_v6 = vld [vmem:[#allocation4 + $0x330] ss:$8 sps:$4 sm:$0xff]   ;;  %v2878_v8 = vld [vmem:[#allocation4 + $0x324] ss:$8 sps:$4 sm:$0xff]   ;;  %v2873_v14 = vld [vmem:[#allocation4 + $0x220] ss:$8 sps:$4 sm:$0xff]  }
 0x147   : > { %v421_v17 = vsub.s32 5, %v3157_v11 }
 0x149   : > { %v2940_v18 = vpop.eup %2939 }
 0x14a   : > { %v1363_v36 = vadd.f32 1.0, %v2940_v18  ;;  %v2876_v18 = vld [vmem:[#allocation4 + $0x320] ss:$8 sps:$4 sm:$0xff]  }
 0x14b   : > { %v2942_v19 = vpop.eup %2941 }
 0x14c   : > { %v2944_v20 = vpop.eup %2943  ;;  %v1364_v28 = vadd.f32 1.0, %v2942_v19  ;;  %v1379_v27 = vmul.f32 %v1363_v36, %v1251_v26  ;;  %v2881_v19 = vld [vmem:[#allocation4 + $0x214] ss:$8 sps:$4 sm:$0xff]   ;;  %v422_v26 = vrot.slane %v3163_v13, %v421_v17  ;;  %v2890_v36 = vld [vmem:[#allocation4 + $0x304] ss:$8 sps:$4 sm:$0xff]  }
 0x14d   : > { %v2946_v21 = vpop.eup %2945  ;;  %v1366_v35 = vadd.f32 1.0, %v2944_v20  ;;  %v429_v20 = vsub.s32 7, %v3157_v11 }
 0x14e   : > { %v2948_v22 = vpop.eup %2947  ;;  %v1371_v25 = vadd.f32 1.0, %v2946_v21  ;;  %v1380_v46 = vmul.f32 %v1364_v28, %v1252_v33  ;;  %v418_v21 = vrot.slane %v3163_v13, %v417_v9 }
 0x14f   : > { %v2950_v16 = vpop.eup %2949  ;;  %v1373_v29 = vadd.f32 1.0, %v2948_v22  ;;  %v1382_v34 = vmul.f32 %v1366_v35, %v1254_v43  ;;  %v2884_v22 = vld [vmem:[#allocation4 + $0x314] ss:$8 sps:$4 sm:$0xff]   ;;  %v2885_v43 = vld [vmem:[#allocation4 + $0x200] ss:$8 sps:$4 sm:$0xff]  }
 0x150   : > { %v2952_v31 = vpop.eup %2951  ;;  %v1365_v42 = vadd.f32 1.0, %v2950_v16  ;;  %v1387_v45 = vmul.f32 %v1371_v25, %v1259_v32  ;;  %v426_v16 = vrot.slane %v3163_v13, %v425_v10  ;;  %v2879_v25 = vld [vmem:[#allocation4 + $0x210] ss:$8 sps:$4 sm:$0xff]   ;;  %v2887_v32 = vld [vmem:[#allocation4 + $0x204] ss:$8 sps:$4 sm:$0xff]  }
 0x151   : > { %v2954_v37 = vpop.eup %2953  ;;  %v1372_v41 = vadd.f32 1.0, %v2952_v31  ;;  %v1389_v48 = vmul.f32 %v1373_v29, %v1261_v39  ;;  %v2882_v29 = vld [vmem:[#allocation4 + $0x310] ss:$8 sps:$4 sm:$0xff]   ;;  %v430_v31 = vrot.slane %v3163_v13, %v429_v20  ;;  %v2897_v10 = vld [vmem:[#allocation4 + $0x2e0] ss:$8 sps:$4 sm:$0xff]  }
 0x152   : > { %v1374_v58 = vadd.f32 1.0, %v2954_v37  ;;  %v1381_v52 = vmul.f32 %v1365_v42, %v1253_v23  ;;  %v1395_v49 = vpack.c.bf16 %v1387_v45, %v1379_v27  ;;  %v2888_v45 = vld [vmem:[#allocation4 + $0x300] ss:$8 sps:$4 sm:$0xff]   ;;  %v2893_v23 = vld [vmem:[#allocation4 + $0x2f4] ss:$8 sps:$4 sm:$0xff]  }
 0x153   : > { %v1388_v47 = vmul.f32 %v1372_v41, %v1260_v40  ;;  %v2905_v20 = vld [vmem:[#allocation4 + $0x2d4] ss:$8 sps:$4 sm:$0xff]  }
 0x154   : > { %v1390_v50 = vmul.f32 %v1374_v58, %v1262_v44  ;;  %v1397_v30 = vpack.c.bf16 %v1389_v48, %v1381_v52 }
 0x155   : > { %v1396_v51 = vpack.c.bf16 %v1388_v47, %v1380_v46 }
 0x156   : > { %v1398_v38 = vpack.c.bf16 %v1390_v50, %v1382_v34  ;;  %v2896_v50 = vld [vmem:[#allocation4 + $0x3f4] ss:$8 sps:$4 sm:$0xff]  }
 0x157   : > { %2215 = vmatprep.mubr.bf16.mxu0 %v1396_v51 }
 0x158   : > { %2258 = vmatprep.mubr.bf16.mxu1 %v1398_v38  ;;  %2216 = vmatmul.mubr.bf16.vlgmr.msra.gmra.mxu0 %v1395_v49 }
 0x159   : > { %2259 = vmatmul.mubr.bf16.vlgmr.msra.gmra.mxu1 %v1397_v30  ;;  %2270 = vmatpush1.bf16.msra.mxu0 %v2843_v54  ;;  %v2891_v30 = vld [vmem:[#allocation4 + $0x2f0] ss:$8 sps:$4 sm:$0xff]  }
 0x15a   : > { %2313 = vmatpush1.bf16.msra.mxu1 %v2846_v55  ;;  %2271 = vmatprep.subr.bf16.mxu0 %v2851_v56 }
 0x15b   : > { %2314 = vmatprep.subr.bf16.mxu1 %v2854_v53 }
 0x15d   : > { %2272 = vmatpush1.bf16.msra.mxu0 %v2849_v24 }
 0x15e   : > { %2315 = vmatpush1.bf16.msra.mxu1 %v2852_v57  ;;  %2273 = vmatprep.subr.bf16.mxu0 %v2857_v59  ;;  %v2894_v59 = vld [vmem:[#allocation4 + $0x3f0] ss:$8 sps:$4 sm:$0xff]  }
 0x15f   : > { %2316 = vmatprep.subr.bf16.mxu1 %v2860_v60  ;;  %v2899_v60 = vld [vmem:[#allocation4 + $0x2e4] ss:$8 sps:$4 sm:$0xff]  }
 0x161   : > { %2274 = vmatpush1.bf16.msra.mxu0 %v2855_v61 }
 0x162   : > { %2317 = vmatpush1.bf16.msra.mxu1 %v2858_v62  ;;  %2275 = vmatprep.subr.bf16.mxu0 %v2863_v63 }
 0x163   : > { %2318 = vmatprep.subr.bf16.mxu1 %v2866_v0 }
 0x165   : > { %2276 = vmatpush1.bf16.msra.mxu0 %v2861_v1  ;;  %v2902_v1 = vld [vmem:[#allocation4 + $0x3e4] ss:$8 sps:$4 sm:$0xff]  }
 0x166   : > { %2319 = vmatpush1.bf16.msra.mxu1 %v2864_v2  ;;  %2277 = vmatprep.subr.bf16.mxu0 %v2869_v3 }
 0x167   : > { %2320 = vmatprep.subr.bf16.mxu1 %v2872_v4 }
 0x169   : > { %2278 = vmatpush1.bf16.msra.mxu0 %v2867_v5 }
 0x16a   : > { %2321 = vmatpush1.bf16.msra.mxu1 %v2870_v6  ;;  %2279 = vmatprep.subr.bf16.mxu0 %v2875_v7 }
 0x16b   : > { %2322 = vmatprep.subr.bf16.mxu1 %v2878_v8 }
 0x16d   : > { %2280 = vmatpush1.bf16.msra.mxu0 %v2873_v14 }
 0x16e   : > { %2323 = vmatpush1.bf16.msra.mxu1 %v2876_v18  ;;  %2281 = vmatprep.subr.bf16.mxu0 %v2881_v19  ;;  %v2900_v19 = vld [vmem:[#allocation4 + $0x3e0] ss:$8 sps:$4 sm:$0xff]  }
 0x16f   : > { %v1199_v28 = vpop.f32.mrf.mxu0  ;;  %v1242_v35 = vpop.f32.mrf.mxu1  ;;  %2324 = vmatprep.subr.bf16.mxu1 %v2884_v22 }
 0x170   : > { %v3212_v33 = vadd.f32 %v1199_v28, %v418_v21  ;;  %v3214_v37 = vadd.f32 %v1242_v35, %v426_v16 }
 0x171   : > { %v1201_v39 = vpop.f32.mrf.mxu0  ;;  %2282 = vmatpush1.bf16.msra.mxu0 %v2879_v25  ;;  %v1244_v42 = vpop.f32.mrf.mxu1  ;;  %v2908_v25 = vld [vmem:[#allocation4 + $0x3d4] ss:$8 sps:$4 sm:$0xff]  }
 0x172   : > { %v1271_v40 = vmul.f32 %v3212_v33, %v3212_v33  ;;  %v3218_v41 = vadd.f32 %v1201_v39, %v422_v26  ;;  %v1273_v13 = vmul.f32 %v3214_v37, %v3214_v37  ;;  %2325 = vmatpush1.bf16.msra.mxu1 %v2882_v29  ;;  %v3222_v44 = vadd.f32 %v1244_v42, %v430_v31 }
 0x173   : > { %v1203_v58 = vpop.f32.mrf.mxu0  ;;  %2283 = vmatprep.subr.bf16.mxu0 %v2887_v32  ;;  %v1246_v34 = vpop.f32.mrf.mxu1  ;;  %2326 = vmatprep.subr.bf16.mxu1 %v2890_v36  ;;  %v2906_v32 = vld [vmem:[#allocation4 + $0x3d0] ss:$8 sps:$4 sm:$0xff]  }
 0x174   : > { %v1287_v46 = vmul.f32 %v1271_v40, %v3212_v33  ;;  %v1272_v47 = vmul.f32 %v3218_v41, %v3218_v41  ;;  %v3227_v48 = vadd.f32 %v1203_v58, %v418_v21  ;;  %v1289_v27 = vmul.f32 %v1273_v13, %v3214_v37  ;;  %v2914_v58 = vld [vmem:[#allocation4 + $0x3c4] ss:$8 sps:$4 sm:$0xff]  }
 0x175   : > { %v1274_v51 = vmul.f32 %v3222_v44, %v3222_v44  ;;  %v3232_v52 = vadd.f32 %v1246_v34, %v426_v16  ;;  %v1205_v54 = vpop.f32.mrf.mxu0  ;;  %2284 = vmatpush1.bf16.msra.mxu0 %v2885_v43  ;;  %v1248_v56 = vpop.f32.mrf.mxu1  ;;  %v2911_v43 = vld [vmem:[#allocation4 + $0x2c4] ss:$8 sps:$4 sm:$0xff]   ;;  %v2912_v34 = vld [vmem:[#allocation4 + $0x3c0] ss:$8 sps:$4 sm:$0xff]  }
 0x176   : > { %v1303_v38 = vmul.f32 0.044715, %v1287_v46  ;;  %v1288_v49 = vmul.f32 %v1272_v47, %v3218_v41  ;;  %v1279_v55 = vmul.f32 %v3227_v48, %v3227_v48  ;;  %v1305_v53 = vmul.f32 0.044715, %v1289_v27  ;;  %2327 = vmatpush1.bf16.msra.mxu1 %v2888_v45  ;;  %2285 = vmatprep.subr.bf16.mxu0 %v2893_v23  ;;  %v2909_v46 = vld [vmem:[#allocation4 + $0x2c0] ss:$8 sps:$4 sm:$0xff]  }
 0x177   : > { %v1290_v24 = vmul.f32 %v1274_v51, %v3222_v44  ;;  %v1281_v57 = vmul.f32 %v3232_v52, %v3232_v52  ;;  %v3242_v0 = vadd.f32 %v1205_v54, %v422_v26  ;;  %2328 = vmatprep.subr.bf16.mxu1 %v2896_v50  ;;  %v3246_v5 = vadd.f32 %v1248_v56, %v430_v31  ;;  %v2903_v31 = vld [vmem:[#allocation4 + $0x2d0] ss:$8 sps:$4 sm:$0xff]   ;;  %v2917_v50 = vld [vmem:[#allocation4 + $0x2b4] ss:$8 sps:$4 sm:$0xff]   ;;  %v2921_v56 = vld [vmem:[#allocation4 + $0x2a0] ss:$8 sps:$4 sm:$0xff]  }
 0x178   : > { %v1319_v61 = vadd.f32 %v1303_v38, %v3212_v33  ;;  %v1304_v62 = vmul.f32 0.044715, %v1288_v49  ;;  %v1295_v63 = vmul.f32 %v1279_v55, %v3227_v48  ;;  %v1321_v2 = vadd.f32 %v1305_v53, %v3214_v37  ;;  %v2920_v27 = vld [vmem:[#allocation4 + $0x3b4] ss:$8 sps:$4 sm:$0xff]   ;;  %v2915_v51 = vld [vmem:[#allocation4 + $0x2b0] ss:$8 sps:$4 sm:$0xff]  }
 0x179   : > { %v1306_v3 = vmul.f32 0.044715, %v1290_v24  ;;  %v1297_v4 = vmul.f32 %v1281_v57, %v3232_v52  ;;  %v1280_v9 = vmul.f32 %v3242_v0, %v3242_v0  ;;  %2286 = vmatpush2.bf16.msra.mxu0 %v2891_v30  ;;  %v1282_v18 = vmul.f32 %v3246_v5, %v3246_v5  ;;  %v2918_v54 = vld [vmem:[#allocation4 + $0x3b0] ss:$8 sps:$4 sm:$0xff]   ;;  %v2923_v38 = vld [vmem:[#allocation4 + $0x2a4] ss:$8 sps:$4 sm:$0xff]  }
 0x17a   : > { %v1335_v6 = vmul.f32 0.7978846, %v1319_v61  ;;  %v1320_v7 = vadd.f32 %v1304_v62, %v3218_v41  ;;  %v1311_v8 = vmul.f32 0.044715, %v1295_v63  ;;  %2329 = vmatpush2.bf16.msra.mxu1 %v2894_v59  ;;  %2287 = vmatprep.subr.bf16.mxu0 %v2899_v60  ;;  %v1337_v35 = vmul.f32 0.7978846, %v1321_v2 }
 0x17b   : > { %v1322_v14 = vadd.f32 %v1306_v3, %v3222_v44  ;;  %v1313_v17 = vmul.f32 0.044715, %v1297_v4  ;;  %v1296_v16 = vmul.f32 %v1280_v9, %v3242_v0  ;;  %2330 = vmatprep.subr.bf16.mxu1 %v2902_v1  ;;  %v1298_v29 = vmul.f32 %v1282_v18, %v3246_v5  ;;  %v2926_v49 = vld [vmem:[#allocation4 + $0x3a4] ss:$8 sps:$4 sm:$0xff]   ;;  %v2924_v53 = vld [vmem:[#allocation4 + $0x3a0] ss:$8 sps:$4 sm:$0xff]  }
 0x17c   : > { %v1336_v21 = vmul.f32 0.7978846, %v1320_v7  ;;  %v1327_v22 = vadd.f32 %v1311_v8, %v3227_v48  ;;  %2955 = vtanh.f32 %v1335_v6  ;;  %v2929_v24 = vld [vmem:[#allocation4 + $0x294] ss:$8 sps:$4 sm:$0xff]   ;;  %v2927_v62 = vld [vmem:[#allocation4 + $0x290] ss:$8 sps:$4 sm:$0xff]  }
 0x17d   : > { %v1338_v26 = vmul.f32 0.7978846, %v1322_v14  ;;  %v1329_v28 = vadd.f32 %v1313_v17, %v3232_v52  ;;  %v1312_v39 = vmul.f32 0.044715, %v1296_v16  ;;  %2288 = vmatpush2.bf16.msra.mxu0 %v2897_v10  ;;  %v1314_v42 = vmul.f32 0.044715, %v1298_v29 }
 0x17e   : > { %2957 = vtanh.f32 %v1336_v21  ;;  %v1343_v36 = vmul.f32 0.7978846, %v1327_v22  ;;  %2331 = vmatpush2.bf16.msra.mxu1 %v2900_v19  ;;  %2289 = vmatprep.subr.bf16.mxu0 %v2905_v20  ;;  %v2932_v59 = vld [vmem:[#allocation4 + $0x394] ss:$8 sps:$4 sm:$0xff]   ;;  %v2930_v1 = vld [vmem:[#allocation4 + $0x390] ss:$8 sps:$4 sm:$0xff]  }
 0x17f   : > { %2959 = vtanh.f32 %v1338_v26  ;;  %v1345_v40 = vmul.f32 0.7978846, %v1329_v28  ;;  %v1328_v13 = vadd.f32 %v1312_v39, %v3242_v0  ;;  %2332 = vmatprep.subr.bf16.mxu1 %v2908_v25  ;;  %v1330_v45 = vadd.f32 %v1314_v42, %v3246_v5  ;;  %v2935_v2 = vld [vmem:[#allocation4 + $0x284] ss:$8 sps:$4 sm:$0xff]   ;;  %v2933_v21 = vld [vmem:[#allocation4 + $0x280] ss:$8 sps:$4 sm:$0xff]  }
 0x180   : > { %2961 = vtanh.f32 %v1343_v36  ;;  %v1255_v4 = vmul.f32 0.5, %v3212_v33  ;;  %v2938_v6 = vld [vmem:[#allocation4 + $0x384] ss:$8 sps:$4 sm:$0xff]   ;;  %v1263_v10 = vmul.f32 0.5, %v3227_v48  ;;  %v1256_v14 = vmul.f32 0.5, %v3218_v41 }
 0x181   : > { %2963 = vtanh.f32 %v1345_v40  ;;  %v1344_v23 = vmul.f32 0.7978846, %v1328_v13  ;;  %2290 = vmatpush2.bf16.msra.mxu0 %v2903_v31  ;;  %v1346_v47 = vmul.f32 0.7978846, %v1330_v45  ;;  %v1265_v20 = vmul.f32 0.5, %v3232_v52 }
 0x182   : > { %2965 = vtanh.f32 %v1337_v35  ;;  %2333 = vmatpush2.bf16.msra.mxu1 %v2906_v32  ;;  %2291 = vmatprep.subr.bf16.mxu0 %v2911_v43  ;;  %v1264_v22 = vmul.f32 0.5, %v3242_v0  ;;  %v2936_v25 = vld [vmem:[#allocation4 + $0x380] ss:$8 sps:$4 sm:$0xff]   ;;  %v1258_v26 = vmul.f32 0.5, %v3222_v44  ;;  %v1266_v48 = vmul.f32 0.5, %v3246_v5 }
 0x183   : > { %2967 = vtanh.f32 %v1344_v23  ;;  %2334 = vmatprep.subr.bf16.mxu1 %v2914_v58  ;;  %v1257_v29 = vmul.f32 0.5, %v3214_v37  ;;  %v1531_v13 = vld [vmem:[%s3287_s4] sm:$0x3] }
 0x184   : > { %2969 = vtanh.f32 %v1346_v47  ;;  %v1536_v45 = vrot.slane %v1531_v13, %v401_v12 }
 0x185   : > { %2292 = vmatpush2.bf16.msra.mxu0 %v2909_v46  ;;  %v1540_v46 = vrot.slane %v1531_v13, %v405_v15 }
 0x186   : > { %2335 = vmatpush2.bf16.msra.mxu1 %v2912_v34  ;;  %2293 = vmatprep.subr.bf16.mxu0 %v2917_v50 }
 0x187   : > { %2336 = vmatprep.subr.bf16.mxu1 %v2920_v27 }
 0x189   : > { %v2956_v55 = vpop.eup %2955  ;;  %2294 = vmatpush2.bf16.msra.mxu0 %v2915_v51 }
 0x18a   : > { %2337 = vmatpush2.bf16.msra.mxu1 %v2918_v54  ;;  %2295 = vmatprep.subr.bf16.mxu0 %v2923_v38  ;;  %v1367_v18 = vadd.f32 1.0, %v2956_v55 }
 0x18b   : > { %v2958_v30 = vpop.eup %2957  ;;  %2338 = vmatprep.subr.bf16.mxu1 %v2926_v49 }
 0x18c   : > { %v2960_v57 = vpop.eup %2959  ;;  %v1368_v7 = vadd.f32 1.0, %v2958_v30  ;;  %v1383_v0 = vmul.f32 %v1367_v18, %v1255_v4 }
 0x18d   : > { %v2962_v60 = vpop.eup %2961  ;;  %2296 = vmatpush2.bf16.msra.mxu0 %v2921_v56  ;;  %v1370_v17 = vadd.f32 1.0, %v2960_v57 }
 0x18e   : > { %v2964_v61 = vpop.eup %2963  ;;  %2339 = vmatpush2.bf16.msra.mxu1 %v2924_v53  ;;  %2297 = vmatprep.subr.bf16.mxu0 %v2929_v24  ;;  %v1375_v3 = vadd.f32 1.0, %v2962_v60  ;;  %v1384_v31 = vmul.f32 %v1368_v7, %v1256_v14 }
 0x18f   : > { %v2966_v63 = vpop.eup %2965  ;;  %2340 = vmatprep.subr.bf16.mxu1 %v2932_v59  ;;  %v1377_v8 = vadd.f32 1.0, %v2964_v61  ;;  %v1386_v35 = vmul.f32 %v1370_v17, %v1258_v26 }
 0x190   : > { %v2968_v9 = vpop.eup %2967  ;;  %v1369_v33 = vadd.f32 1.0, %v2966_v63  ;;  %v1391_v41 = vmul.f32 %v1375_v3, %v1263_v10 }
 0x191   : > { %v2970_v19 = vpop.eup %2969  ;;  %2298 = vmatpush2.bf16.msra.mxu0 %v2927_v62  ;;  %v1376_v16 = vadd.f32 1.0, %v2968_v9  ;;  %v1393_v32 = vmul.f32 %v1377_v8, %v1265_v20 }
 0x192   : > { %2341 = vmatpush2.bf16.msra.mxu1 %v2930_v1  ;;  %2299 = vmatprep.subr.bf16.mxu0 %v2935_v2  ;;  %v1378_v28 = vadd.f32 1.0, %v2970_v19  ;;  %v1385_v40 = vmul.f32 %v1369_v33, %v1257_v29  ;;  %v1399_v43 = vpack.c.bf16 %v1391_v41, %v1383_v0 }
 0x193   : > { %2342 = vmatprep.subr.bf16.mxu1 %v2938_v6  ;;  %v1392_v52 = vmul.f32 %v1376_v16, %v1264_v22 }
 0x194   : > { %v1394_v36 = vmul.f32 %v1378_v28, %v1266_v48  ;;  %v1401_v44 = vpack.c.bf16 %v1393_v32, %v1385_v40 }
 0x195   : > { %2300 = vmatpush2.bf16.msra.mxu0 %v2933_v21  ;;  %v1400_v39 = vpack.c.bf16 %v1392_v52, %v1384_v31 }
 0x196   : > { %2343 = vmatpush2.bf16.msra.mxu1 %v2936_v25  ;;  %v1402_v42 = vpack.c.bf16 %v1394_v36, %v1386_v35 }
 0x197   : > { %2301 = vmatprep.mubr.bf16.mxu0 %v1400_v39 }
 0x198   : > { %2344 = vmatprep.mubr.bf16.mxu1 %v1402_v42  ;;  %2302 = vmatmul.mubr.bf16.vlgmr.msra.gmra.mxu0 %v1399_v43 }
 0x199   : > { %2345 = vmatmul.mubr.bf16.vlgmr.msra.gmra.mxu1 %v1401_v44 }
 0x218   : > { %v2217_v5 = vpop.f32.mrf.mxu0 }
 0x219   : > { %v2260_v37 = vpop.f32.mrf.mxu1  ;;  %v2218_v34 = vadd.f32 %v2217_v5, %v1536_v45 }
 0x21a   : > { %v2219_v58 = vpop.f32.mrf.mxu0 }
 0x21b   : > { %v2262_v23 = vpop.f32.mrf.mxu1  ;;  %v2220_v27 = vadd.f32 %v2219_v58, %v1540_v46  ;;  %v2261_v54 = vadd.f32 %v2260_v37, %v2218_v34 }
 0x21c   : > { %v2221_v47 = vpop.f32.mrf.mxu0 }
 0x21d   : > { %v2264_v50 = vpop.f32.mrf.mxu1  ;;  %v2222_v38 = vadd.f32 %v2221_v47, %v1536_v45  ;;  %v2263_v56 = vadd.f32 %v2262_v23, %v2220_v27 }
 0x21e   : > { %v2223_v51 = vpop.f32.mrf.mxu0 }
 0x21f   : > { %v2266_v49 = vpop.f32.mrf.mxu1  ;;  %v2224_v30 = vadd.f32 %v2223_v51, %v1540_v46  ;;  %v2265_v12 = vadd.f32 %v2264_v50, %v2222_v38 }
 0x221   : > { %v2267_v61 = vadd.f32 %v2266_v49, %v2224_v30 }
 0x258   : > { %v2303_v55 = vpop.f32.mrf.mxu0 }
 0x259   : > { %v2304_v53 = vadd.f32 %v2303_v55, %v2261_v54  ;;  %v2346_v24 = vpop.f32.mrf.mxu1 }
 0x25a   : > { %v2305_v11 = vpop.f32.mrf.mxu0 }
 0x25b   : > { %v2347_v15 = vadd.f32 %v2346_v24, %v2304_v53  ;;  %v2306_v57 = vadd.f32 %v2305_v11, %v2263_v56  ;;  %v2348_v59 = vpop.f32.mrf.mxu1 }
 0x25c   : > { %v2307_v60 = vpop.f32.mrf.mxu0 }
 0x25d   : > { %2355 = vst [vmem:[%s261_s24] sm:$0xff] %v2347_v15  ;;  %v2349_v62 = vadd.f32 %v2348_v59, %v2306_v57  ;;  %v2308_v63 = vadd.f32 %v2307_v60, %v2265_v12  ;;  %v2350_v1 = vpop.f32.mrf.mxu1 }
 0x25e   : > { %v2309_v2 = vpop.f32.mrf.mxu0 }
 0x25f   : > { %2356 = vst [vmem:[%s261_s24 + $0x8] sm:$0xff] %v2349_v62  ;;  %v2351_v3 = vadd.f32 %v2350_v1, %v2308_v63  ;;  %v2310_v4 = vadd.f32 %v2309_v2, %v2267_v61  ;;  %v2352_v6 = vpop.f32.mrf.mxu1 }
 0x261   : > { %2357 = vst [vmem:[%s261_s24 + $0x10] sm:$0xff] %v2351_v3  ;;  %v2353_v7 = vadd.f32 %v2352_v6, %v2310_v4 }
 0x263   : > { %2358 = vst [vmem:[%s261_s24 + $0x18] sm:$0xff] %v2353_v7 }
 0x264 PF: > { %s17_s18 = sadd.s32 1, %s3037_s18  }
 0x265   : > { %p14_p3 = scmp.ge.s32.totalorder %s17_s18, 4  }
 0x267   :  { %16 = sbr.rel (!%p14_p3) target bundleno = 2 (0x2), region = 79 }
 0x26c   :  { %2383 = vsyncpa [#allocation3], 1 }
 0x26d   :  { %2385 = vsyncpa [#allocation3 + $0x1], 1 }
 0x26e   :  { %2386 = vsyncpa [#allocation5], 1 }

</bundles_post_ra>
